<compile_context>
chip_gen: v7x
topology: tpu7x:2x2x1
jax: 0.10.0
libtpu: 0.0.40
codegen_flags: <defaults>
</compile_context>

<pallas_src>
import jax
import jax.numpy as jnp
from jax.experimental import pallas as pl
from jax.experimental.pallas import tpu as pltpu

_NEG_SLOPE = 0.01  # PyTorch nn.LeakyReLU default negative_slope


def _pick_th(ho, cap=64):
    """Pick an output-row tile height: full Ho if small, else a mult-of-8 divisor."""
    if ho <= cap:
        return ho
    start = cap - (cap % 8)
    for t in range(start, 7, -8):
        if ho % t == 0:
            return t
    return ho  # fallback: single tile over H (still correct)


def _pool_block_kernel(x_ref, w_ref, b_ref, o_ref):
    # x_ref: (1, C, TH, 2*Wrow) f32 VMEM — each row ho holds its two source rows
    #        (kh=0 then kh=1) concatenated along the lane dim.
    # w_ref: (C_out*C*4,) f32 SMEM — row-major flatten of (C_out, C, kh, kw).
    # b_ref: (C_out,) f32 SMEM.
    # o_ref: (1, C_out, TH, Wo) f32 VMEM — final NCHW output tile.
    _, C, TH, W2 = x_ref.shape
    Wrow = W2 // 2
    _, C_out, _, Wo = o_ref.shape

    # Constant 0/1 deinterleave matrices: sel[kw][w', wo] = (w' == 2*wo + kw).
    rows = jax.lax.broadcasted_iota(jnp.int32, (Wrow, Wo), 0)
    cols = jax.lax.broadcasted_iota(jnp.int32, (Wrow, Wo), 1)
    sel = [(rows == 2 * cols + kw).astype(jnp.float32) for kw in (0, 1)]

    # taps[(ci, kh, kw)][t, wo] = x[ci, 2*(h0+t)+kh, 2*wo+kw]  — (TH, Wo) planes.
    # The deinterleave matmul is a pure selection (one 1.0 per column), so it is
    # exact; the MXU is idle in this HBM-bound kernel, so it is effectively free.
    taps = {}
    for ci in range(C):
        for kh in range(2):
            xk = x_ref[0, ci, :, kh * Wrow:(kh + 1) * Wrow]  # (TH, Wrow)
            for kw in range(2):
                taps[(ci, kh, kw)] = jnp.dot(
                    xk, sel[kw],
                    preferred_element_type=jnp.float32,
                    precision=jax.lax.Precision.HIGHEST)

    # Channel mixing + bias + LeakyReLU, all f32 on the VPU (weights from SMEM).
    # TODO(synk): for large C (>~8) this scalar-FMA mixing becomes VPU-bound;
    # move the (ci,kh,kw)->co contraction onto the MXU (stacked (4C,TH,Wo) dot).
    for co in range(C_out):
        acc = None
        for ci in range(C):
            for kh in range(2):
                for kw in range(2):
                    wv = w_ref[((co * C + ci) * 2 + kh) * 2 + kw]
                    term = wv * taps[(ci, kh, kw)]
                    acc = term if acc is None else acc + term
        acc = acc + b_ref[co]
        o_ref[0, co, :, :] = jnp.where(acc > 0, acc, _NEG_SLOPE * acc)


def pool_block_forward(x, weight, bias, *, th_cap=64):
    """x: (N, C, H, W) f32; weight: (C_out, C, 2, 2); bias: (C_out,) -> NCHW out."""
    N, C, H, W = x.shape
    C_out = weight.shape[0]
    Ho, Wo = H // 2, W // 2
    # PyTorch Conv2d(k=2, s=2) silently floors odd spatial dims.
    if (H % 2) or (W % 2):
        x = x[:, :, :2 * Ho, :2 * Wo]
    Wrow = 2 * Wo

    # Free adjacent-dim reshape: row ho of the last dim is
    # concat(x[.., 2ho, :], x[.., 2ho+1, :]) — no data movement in HBM.
    x_rows = x.reshape(N, C, Ho, 2 * Wrow)

    TH = _pick_th(Ho, th_cap)
    # v7x: make sure there are >=2 grid tiles so both TensorCores get work.
    if N * (Ho // TH) < 2 and TH % 16 == 0:
        TH //= 2
    grid = (N, Ho // TH)

    w_flat = weight.reshape(-1).astype(jnp.float32)   # (co, ci, kh, kw) row-major
    b_vec = bias.astype(jnp.float32)

    return pl.pallas_call(
        _pool_block_kernel,
        out_shape=jax.ShapeDtypeStruct((N, C_out, Ho, Wo), x.dtype),
        grid_spec=pltpu.PrefetchScalarGridSpec(
            num_scalar_prefetch=0,
            grid=grid,
            in_specs=[
                # Streamed NCHW row-pair slab for one batch / one Ho tile.
                pl.BlockSpec((1, C, TH, 2 * Wrow), lambda n, h: (n, 0, h, 0)),
                # Tiny conv weights / bias live in SMEM (scalar reads).
                pl.BlockSpec(memory_space=pltpu.MemorySpace.SMEM),
                pl.BlockSpec(memory_space=pltpu.MemorySpace.SMEM),
            ],
            out_specs=pl.BlockSpec((1, C_out, TH, Wo), lambda n, h: (n, 0, h, 0)),
        ),
        compiler_params=pltpu.CompilerParams(
            dimension_semantics=("parallel", "parallel"),
            vmem_limit_bytes=32 * 1024 * 1024,
        ),
    )(x_rows, w_flat, b_vec)


def _reference(x, weight, bias):
    # Pure-JAX f32 reference: lax conv in NCHW + LeakyReLU.
    y = jax.lax.conv_general_dilated(
        x, weight, window_strides=(2, 2), padding="VALID",
        dimension_numbers=("NCHW", "OIHW", "NCHW"),
        precision=jax.lax.Precision.HIGHEST)
    y = y + bias.reshape(1, -1, 1, 1)
    return jnp.where(y > 0, y, _NEG_SLOPE * y)


if __name__ == "__main__":
    key = jax.random.PRNGKey(0)
    k_x, k_w, k_b = jax.random.split(key, 3)

    N, C, H, W = 2, 4, 16, 16
    x = jax.random.normal(k_x, (N, C, H, W), dtype=jnp.float32)

    # Deterministic parameter init (uniform in +/- 1/sqrt(fan_in), like torch).
    fan_in = C * 2 * 2
    bound = 1.0 / (fan_in ** 0.5)
    weight = jax.random.uniform(k_w, (C, C, 2, 2), jnp.float32, -bound, bound)
    bias = jax.random.uniform(k_b, (C,), jnp.float32, -bound, bound)

    fwd = jax.jit(pool_block_forward)
    out = jax.block_until_ready(fwd(x, weight, bias))
    assert out.shape == (N, C, H // 2, W // 2)

    # Whole pipeline stays in f32 -> tight agreement with the f32 reference
    # (tolerance left with headroom for MXU precision-mode differences).
    ref = jax.block_until_ready(_reference(x, weight, bias))
    assert jnp.allclose(out, ref, atol=5e-3, rtol=5e-3), float(
        jnp.max(jnp.abs(out - ref)))

    print("KERNEL_OK")
</pallas_src>

<mosaic_0001>
module attributes {stable_mosaic.version = 11 : i64} {
  func.func @_pool_block_kernel(%arg0: i32, %arg1: i32, %arg2: memref<1x4x8x32xf32, #tpu.memory_space<vmem>>, %arg3: memref<64xf32, #tpu.memory_space<smem>>, %arg4: memref<4xf32, #tpu.memory_space<smem>>, %arg5: memref<1x4x8x8xf32, #tpu.memory_space<vmem>>) attributes {dimension_semantics = [#tpu.dimension_semantics<parallel>, #tpu.dimension_semantics<parallel>], iteration_bounds = array<i64: 2, 1>, scalar_prefetch = 0 : i64, scratch_operands = 0 : i64, tpu.core_type = #tpu.core_type<tc>, window_params = [{transform_indices = @transform_0, window_bounds = array<i64: 1, 4, 8, 32>}, {transform_indices = @transform_1, window_bounds = array<i64: 64>}, {transform_indices = @transform_2, window_bounds = array<i64: 4>}, {transform_indices = @transform_3, window_bounds = array<i64: 1, 4, 8, 8>}]} {
    %0 = tpu.iota {dimensions = array<i32: 0>} : vector<16x8xi32>
    %1 = tpu.iota {dimensions = array<i32: 1>} : vector<16x8xi32>
    %c2_i32 = arith.constant 2 : i32
    %2 = vector.broadcast %c2_i32 : i32 to vector<16x8xi32>
    %3 = arith.muli %2, %1 : vector<16x8xi32>
    %c0_i32 = arith.constant 0 : i32
    %4 = vector.broadcast %c0_i32 : i32 to vector<16x8xi32>
    %5 = arith.addi %3, %4 : vector<16x8xi32>
    %6 = arith.cmpi eq, %0, %5 : vector<16x8xi32>
    %7 = arith.extui %6 : vector<16x8xi1> to vector<16x8xi32>
    %8 = arith.sitofp %7 : vector<16x8xi32> to vector<16x8xf32>
    %c2_i32_0 = arith.constant 2 : i32
    %9 = vector.broadcast %c2_i32_0 : i32 to vector<16x8xi32>
    %10 = arith.muli %9, %1 : vector<16x8xi32>
    %c1_i32 = arith.constant 1 : i32
    %11 = vector.broadcast %c1_i32 : i32 to vector<16x8xi32>
    %12 = arith.addi %10, %11 : vector<16x8xi32>
    %13 = arith.cmpi eq, %0, %12 : vector<16x8xi32>
    %14 = arith.extui %13 : vector<16x8xi1> to vector<16x8xi32>
    %15 = arith.sitofp %14 : vector<16x8xi32> to vector<16x8xf32>
    %c0 = arith.constant 0 : index
    %c0_1 = arith.constant 0 : index
    %c0_2 = arith.constant 0 : index
    %c0_3 = arith.constant 0 : index
    %16 = vector.load %arg2[%c0, %c0_1, %c0_2, %c0_3] : memref<1x4x8x32xf32, #tpu.memory_space<vmem>>, vector<1x1x8x16xf32>
    %17 = vector.shape_cast %16 : vector<1x1x8x16xf32> to vector<8x16xf32>
    %cst = arith.constant dense<0.000000e+00> : vector<8x8xf32>
    %18 = tpu.matmul %17, %8, %cst {dimension_numbers = #tpu.dot_dimension_numbers<[1], [0], [0], [1], [0, 0, 1, 1], [], []>, precision = #tpu.contract_precision<fp32>} : vector<8x16xf32>, vector<16x8xf32>, vector<8x8xf32> -> vector<8x8xf32>
    %cst_4 = arith.constant dense<0.000000e+00> : vector<8x8xf32>
    %19 = tpu.matmul %17, %15, %cst_4 {dimension_numbers = #tpu.dot_dimension_numbers<[1], [0], [0], [1], [0, 0, 1, 1], [], []>, precision = #tpu.contract_precision<fp32>} : vector<8x16xf32>, vector<16x8xf32>, vector<8x8xf32> -> vector<8x8xf32>
    %c0_5 = arith.constant 0 : index
    %c0_6 = arith.constant 0 : index
    %c0_7 = arith.constant 0 : index
    %c16 = arith.constant 16 : index
    %20 = vector.load %arg2[%c0_5, %c0_6, %c0_7, %c16] : memref<1x4x8x32xf32, #tpu.memory_space<vmem>>, vector<1x1x8x16xf32>
    %21 = vector.shape_cast %20 : vector<1x1x8x16xf32> to vector<8x16xf32>
    %cst_8 = arith.constant dense<0.000000e+00> : vector<8x8xf32>
    %22 = tpu.matmul %21, %8, %cst_8 {dimension_numbers = #tpu.dot_dimension_numbers<[1], [0], [0], [1], [0, 0, 1, 1], [], []>, precision = #tpu.contract_precision<fp32>} : vector<8x16xf32>, vector<16x8xf32>, vector<8x8xf32> -> vector<8x8xf32>
    %cst_9 = arith.constant dense<0.000000e+00> : vector<8x8xf32>
    %23 = tpu.matmul %21, %15, %cst_9 {dimension_numbers = #tpu.dot_dimension_numbers<[1], [0], [0], [1], [0, 0, 1, 1], [], []>, precision = #tpu.contract_precision<fp32>} : vector<8x16xf32>, vector<16x8xf32>, vector<8x8xf32> -> vector<8x8xf32>
    %c0_10 = arith.constant 0 : index
    %c1 = arith.constant 1 : index
    %c0_11 = arith.constant 0 : index
    %c0_12 = arith.constant 0 : index
    %24 = vector.load %arg2[%c0_10, %c1, %c0_11, %c0_12] : memref<1x4x8x32xf32, #tpu.memory_space<vmem>>, vector<1x1x8x16xf32>
    %25 = vector.shape_cast %24 : vector<1x1x8x16xf32> to vector<8x16xf32>
    %cst_13 = arith.constant dense<0.000000e+00> : vector<8x8xf32>
    %26 = tpu.matmul %25, %8, %cst_13 {dimension_numbers = #tpu.dot_dimension_numbers<[1], [0], [0], [1], [0, 0, 1, 1], [], []>, precision = #tpu.contract_precision<fp32>} : vector<8x16xf32>, vector<16x8xf32>, vector<8x8xf32> -> vector<8x8xf32>
    %cst_14 = arith.constant dense<0.000000e+00> : vector<8x8xf32>
    %27 = tpu.matmul %25, %15, %cst_14 {dimension_numbers = #tpu.dot_dimension_numbers<[1], [0], [0], [1], [0, 0, 1, 1], [], []>, precision = #tpu.contract_precision<fp32>} : vector<8x16xf32>, vector<16x8xf32>, vector<8x8xf32> -> vector<8x8xf32>
    %c0_15 = arith.constant 0 : index
    %c1_16 = arith.constant 1 : index
    %c0_17 = arith.constant 0 : index
    %c16_18 = arith.constant 16 : index
    %28 = vector.load %arg2[%c0_15, %c1_16, %c0_17, %c16_18] : memref<1x4x8x32xf32, #tpu.memory_space<vmem>>, vector<1x1x8x16xf32>
    %29 = vector.shape_cast %28 : vector<1x1x8x16xf32> to vector<8x16xf32>
    %cst_19 = arith.constant dense<0.000000e+00> : vector<8x8xf32>
    %30 = tpu.matmul %29, %8, %cst_19 {dimension_numbers = #tpu.dot_dimension_numbers<[1], [0], [0], [1], [0, 0, 1, 1], [], []>, precision = #tpu.contract_precision<fp32>} : vector<8x16xf32>, vector<16x8xf32>, vector<8x8xf32> -> vector<8x8xf32>
    %cst_20 = arith.constant dense<0.000000e+00> : vector<8x8xf32>
    %31 = tpu.matmul %29, %15, %cst_20 {dimension_numbers = #tpu.dot_dimension_numbers<[1], [0], [0], [1], [0, 0, 1, 1], [], []>, precision = #tpu.contract_precision<fp32>} : vector<8x16xf32>, vector<16x8xf32>, vector<8x8xf32> -> vector<8x8xf32>
    %c0_21 = arith.constant 0 : index
    %c2 = arith.constant 2 : index
    %c0_22 = arith.constant 0 : index
    %c0_23 = arith.constant 0 : index
    %32 = vector.load %arg2[%c0_21, %c2, %c0_22, %c0_23] : memref<1x4x8x32xf32, #tpu.memory_space<vmem>>, vector<1x1x8x16xf32>
    %33 = vector.shape_cast %32 : vector<1x1x8x16xf32> to vector<8x16xf32>
    %cst_24 = arith.constant dense<0.000000e+00> : vector<8x8xf32>
    %34 = tpu.matmul %33, %8, %cst_24 {dimension_numbers = #tpu.dot_dimension_numbers<[1], [0], [0], [1], [0, 0, 1, 1], [], []>, precision = #tpu.contract_precision<fp32>} : vector<8x16xf32>, vector<16x8xf32>, vector<8x8xf32> -> vector<8x8xf32>
    %cst_25 = arith.constant dense<0.000000e+00> : vector<8x8xf32>
    %35 = tpu.matmul %33, %15, %cst_25 {dimension_numbers = #tpu.dot_dimension_numbers<[1], [0], [0], [1], [0, 0, 1, 1], [], []>, precision = #tpu.contract_precision<fp32>} : vector<8x16xf32>, vector<16x8xf32>, vector<8x8xf32> -> vector<8x8xf32>
    %c0_26 = arith.constant 0 : index
    %c2_27 = arith.constant 2 : index
    %c0_28 = arith.constant 0 : index
    %c16_29 = arith.constant 16 : index
    %36 = vector.load %arg2[%c0_26, %c2_27, %c0_28, %c16_29] : memref<1x4x8x32xf32, #tpu.memory_space<vmem>>, vector<1x1x8x16xf32>
    %37 = vector.shape_cast %36 : vector<1x1x8x16xf32> to vector<8x16xf32>
    %cst_30 = arith.constant dense<0.000000e+00> : vector<8x8xf32>
    %38 = tpu.matmul %37, %8, %cst_30 {dimension_numbers = #tpu.dot_dimension_numbers<[1], [0], [0], [1], [0, 0, 1, 1], [], []>, precision = #tpu.contract_precision<fp32>} : vector<8x16xf32>, vector<16x8xf32>, vector<8x8xf32> -> vector<8x8xf32>
    %cst_31 = arith.constant dense<0.000000e+00> : vector<8x8xf32>
    %39 = tpu.matmul %37, %15, %cst_31 {dimension_numbers = #tpu.dot_dimension_numbers<[1], [0], [0], [1], [0, 0, 1, 1], [], []>, precision = #tpu.contract_precision<fp32>} : vector<8x16xf32>, vector<16x8xf32>, vector<8x8xf32> -> vector<8x8xf32>
    %c0_32 = arith.constant 0 : index
    %c3 = arith.constant 3 : index
    %c0_33 = arith.constant 0 : index
    %c0_34 = arith.constant 0 : index
    %40 = vector.load %arg2[%c0_32, %c3, %c0_33, %c0_34] : memref<1x4x8x32xf32, #tpu.memory_space<vmem>>, vector<1x1x8x16xf32>
    %41 = vector.shape_cast %40 : vector<1x1x8x16xf32> to vector<8x16xf32>
    %cst_35 = arith.constant dense<0.000000e+00> : vector<8x8xf32>
    %42 = tpu.matmul %41, %8, %cst_35 {dimension_numbers = #tpu.dot_dimension_numbers<[1], [0], [0], [1], [0, 0, 1, 1], [], []>, precision = #tpu.contract_precision<fp32>} : vector<8x16xf32>, vector<16x8xf32>, vector<8x8xf32> -> vector<8x8xf32>
    %cst_36 = arith.constant dense<0.000000e+00> : vector<8x8xf32>
    %43 = tpu.matmul %41, %15, %cst_36 {dimension_numbers = #tpu.dot_dimension_numbers<[1], [0], [0], [1], [0, 0, 1, 1], [], []>, precision = #tpu.contract_precision<fp32>} : vector<8x16xf32>, vector<16x8xf32>, vector<8x8xf32> -> vector<8x8xf32>
    %c0_37 = arith.constant 0 : index
    %c3_38 = arith.constant 3 : index
    %c0_39 = arith.constant 0 : index
    %c16_40 = arith.constant 16 : index
    %44 = vector.load %arg2[%c0_37, %c3_38, %c0_39, %c16_40] : memref<1x4x8x32xf32, #tpu.memory_space<vmem>>, vector<1x1x8x16xf32>
    %45 = vector.shape_cast %44 : vector<1x1x8x16xf32> to vector<8x16xf32>
    %cst_41 = arith.constant dense<0.000000e+00> : vector<8x8xf32>
    %46 = tpu.matmul %45, %8, %cst_41 {dimension_numbers = #tpu.dot_dimension_numbers<[1], [0], [0], [1], [0, 0, 1, 1], [], []>, precision = #tpu.contract_precision<fp32>} : vector<8x16xf32>, vector<16x8xf32>, vector<8x8xf32> -> vector<8x8xf32>
    %cst_42 = arith.constant dense<0.000000e+00> : vector<8x8xf32>
    %47 = tpu.matmul %45, %15, %cst_42 {dimension_numbers = #tpu.dot_dimension_numbers<[1], [0], [0], [1], [0, 0, 1, 1], [], []>, precision = #tpu.contract_precision<fp32>} : vector<8x16xf32>, vector<16x8xf32>, vector<8x8xf32> -> vector<8x8xf32>
    %c0_43 = arith.constant 0 : index
    %48 = memref.load %arg3[%c0_43] : memref<64xf32, #tpu.memory_space<smem>>
    %49 = vector.broadcast %48 : f32 to vector<8x8xf32>
    %50 = arith.mulf %49, %18 : vector<8x8xf32>
    %c1_44 = arith.constant 1 : index
    %51 = memref.load %arg3[%c1_44] : memref<64xf32, #tpu.memory_space<smem>>
    %52 = vector.broadcast %51 : f32 to vector<8x8xf32>
    %53 = arith.mulf %52, %19 : vector<8x8xf32>
    %54 = arith.addf %50, %53 : vector<8x8xf32>
    %c2_45 = arith.constant 2 : index
    %55 = memref.load %arg3[%c2_45] : memref<64xf32, #tpu.memory_space<smem>>
    %56 = vector.broadcast %55 : f32 to vector<8x8xf32>
    %57 = arith.mulf %56, %22 : vector<8x8xf32>
    %58 = arith.addf %54, %57 : vector<8x8xf32>
    %c3_46 = arith.constant 3 : index
    %59 = memref.load %arg3[%c3_46] : memref<64xf32, #tpu.memory_space<smem>>
    %60 = vector.broadcast %59 : f32 to vector<8x8xf32>
    %61 = arith.mulf %60, %23 : vector<8x8xf32>
    %62 = arith.addf %58, %61 : vector<8x8xf32>
    %c4 = arith.constant 4 : index
    %63 = memref.load %arg3[%c4] : memref<64xf32, #tpu.memory_space<smem>>
    %64 = vector.broadcast %63 : f32 to vector<8x8xf32>
    %65 = arith.mulf %64, %26 : vector<8x8xf32>
    %66 = arith.addf %62, %65 : vector<8x8xf32>
    %c5 = arith.constant 5 : index
    %67 = memref.load %arg3[%c5] : memref<64xf32, #tpu.memory_space<smem>>
    %68 = vector.broadcast %67 : f32 to vector<8x8xf32>
    %69 = arith.mulf %68, %27 : vector<8x8xf32>
    %70 = arith.addf %66, %69 : vector<8x8xf32>
    %c6 = arith.constant 6 : index
    %71 = memref.load %arg3[%c6] : memref<64xf32, #tpu.memory_space<smem>>
    %72 = vector.broadcast %71 : f32 to vector<8x8xf32>
    %73 = arith.mulf %72, %30 : vector<8x8xf32>
    %74 = arith.addf %70, %73 : vector<8x8xf32>
    %c7 = arith.constant 7 : index
    %75 = memref.load %arg3[%c7] : memref<64xf32, #tpu.memory_space<smem>>
    %76 = vector.broadcast %75 : f32 to vector<8x8xf32>
    %77 = arith.mulf %76, %31 : vector<8x8xf32>
    %78 = arith.addf %74, %77 : vector<8x8xf32>
    %c8 = arith.constant 8 : index
    %79 = memref.load %arg3[%c8] : memref<64xf32, #tpu.memory_space<smem>>
    %80 = vector.broadcast %79 : f32 to vector<8x8xf32>
    %81 = arith.mulf %80, %34 : vector<8x8xf32>
    %82 = arith.addf %78, %81 : vector<8x8xf32>
    %c9 = arith.constant 9 : index
    %83 = memref.load %arg3[%c9] : memref<64xf32, #tpu.memory_space<smem>>
    %84 = vector.broadcast %83 : f32 to vector<8x8xf32>
    %85 = arith.mulf %84, %35 : vector<8x8xf32>
    %86 = arith.addf %82, %85 : vector<8x8xf32>
    %c10 = arith.constant 10 : index
    %87 = memref.load %arg3[%c10] : memref<64xf32, #tpu.memory_space<smem>>
    %88 = vector.broadcast %87 : f32 to vector<8x8xf32>
    %89 = arith.mulf %88, %38 : vector<8x8xf32>
    %90 = arith.addf %86, %89 : vector<8x8xf32>
    %c11 = arith.constant 11 : index
    %91 = memref.load %arg3[%c11] : memref<64xf32, #tpu.memory_space<smem>>
    %92 = vector.broadcast %91 : f32 to vector<8x8xf32>
    %93 = arith.mulf %92, %39 : vector<8x8xf32>
    %94 = arith.addf %90, %93 : vector<8x8xf32>
    %c12 = arith.constant 12 : index
    %95 = memref.load %arg3[%c12] : memref<64xf32, #tpu.memory_space<smem>>
    %96 = vector.broadcast %95 : f32 to vector<8x8xf32>
    %97 = arith.mulf %96, %42 : vector<8x8xf32>
    %98 = arith.addf %94, %97 : vector<8x8xf32>
    %c13 = arith.constant 13 : index
    %99 = memref.load %arg3[%c13] : memref<64xf32, #tpu.memory_space<smem>>
    %100 = vector.broadcast %99 : f32 to vector<8x8xf32>
    %101 = arith.mulf %100, %43 : vector<8x8xf32>
    %102 = arith.addf %98, %101 : vector<8x8xf32>
    %c14 = arith.constant 14 : index
    %103 = memref.load %arg3[%c14] : memref<64xf32, #tpu.memory_space<smem>>
    %104 = vector.broadcast %103 : f32 to vector<8x8xf32>
    %105 = arith.mulf %104, %46 : vector<8x8xf32>
    %106 = arith.addf %102, %105 : vector<8x8xf32>
    %c15 = arith.constant 15 : index
    %107 = memref.load %arg3[%c15] : memref<64xf32, #tpu.memory_space<smem>>
    %108 = vector.broadcast %107 : f32 to vector<8x8xf32>
    %109 = arith.mulf %108, %47 : vector<8x8xf32>
    %110 = arith.addf %106, %109 : vector<8x8xf32>
    %c0_47 = arith.constant 0 : index
    %111 = memref.load %arg4[%c0_47] : memref<4xf32, #tpu.memory_space<smem>>
    %112 = vector.broadcast %111 : f32 to vector<8x8xf32>
    %113 = arith.addf %110, %112 : vector<8x8xf32>
    %cst_48 = arith.constant 0.000000e+00 : f32
    %114 = vector.broadcast %cst_48 : f32 to vector<8x8xf32>
    %115 = arith.cmpf ogt, %113, %114 : vector<8x8xf32>
    %cst_49 = arith.constant 0.00999999977 : f32
    %116 = vector.broadcast %cst_49 : f32 to vector<8x8xf32>
    %117 = arith.mulf %116, %113 : vector<8x8xf32>
    %118 = arith.select %115, %113, %117 : vector<8x8xi1>, vector<8x8xf32>
    %c0_50 = arith.constant 0 : index
    %c0_51 = arith.constant 0 : index
    %c0_52 = arith.constant 0 : index
    %c0_53 = arith.constant 0 : index
    %119 = vector.load %arg5[%c0_50, %c0_51, %c0_52, %c0_53] : memref<1x4x8x8xf32, #tpu.memory_space<vmem>>, vector<1x1x8x8xf32>
    %120 = vector.shape_cast %119 : vector<1x1x8x8xf32> to vector<8x8xf32>
    %121 = vector.shape_cast %118 : vector<8x8xf32> to vector<1x1x8x8xf32>
    tpu.vector_store %arg5[%c0_50, %c0_51, %c0_52, %c0_53], %121 {strides = array<i32>} : memref<1x4x8x8xf32, #tpu.memory_space<vmem>>, vector<1x1x8x8xf32>,
    %c16_54 = arith.constant 16 : index
    %122 = memref.load %arg3[%c16_54] : memref<64xf32, #tpu.memory_space<smem>>
    %123 = vector.broadcast %122 : f32 to vector<8x8xf32>
    %124 = arith.mulf %123, %18 : vector<8x8xf32>
    %c17 = arith.constant 17 : index
    %125 = memref.load %arg3[%c17] : memref<64xf32, #tpu.memory_space<smem>>
    %126 = vector.broadcast %125 : f32 to vector<8x8xf32>
    %127 = arith.mulf %126, %19 : vector<8x8xf32>
    %128 = arith.addf %124, %127 : vector<8x8xf32>
    %c18 = arith.constant 18 : index
    %129 = memref.load %arg3[%c18] : memref<64xf32, #tpu.memory_space<smem>>
    %130 = vector.broadcast %129 : f32 to vector<8x8xf32>
    %131 = arith.mulf %130, %22 : vector<8x8xf32>
    %132 = arith.addf %128, %131 : vector<8x8xf32>
    %c19 = arith.constant 19 : index
    %133 = memref.load %arg3[%c19] : memref<64xf32, #tpu.memory_space<smem>>
    %134 = vector.broadcast %133 : f32 to vector<8x8xf32>
    %135 = arith.mulf %134, %23 : vector<8x8xf32>
    %136 = arith.addf %132, %135 : vector<8x8xf32>
    %c20 = arith.constant 20 : index
    %137 = memref.load %arg3[%c20] : memref<64xf32, #tpu.memory_space<smem>>
    %138 = vector.broadcast %137 : f32 to vector<8x8xf32>
    %139 = arith.mulf %138, %26 : vector<8x8xf32>
    %140 = arith.addf %136, %139 : vector<8x8xf32>
    %c21 = arith.constant 21 : index
    %141 = memref.load %arg3[%c21] : memref<64xf32, #tpu.memory_space<smem>>
    %142 = vector.broadcast %141 : f32 to vector<8x8xf32>
    %143 = arith.mulf %142, %27 : vector<8x8xf32>
    %144 = arith.addf %140, %143 : vector<8x8xf32>
    %c22 = arith.constant 22 : index
    %145 = memref.load %arg3[%c22] : memref<64xf32, #tpu.memory_space<smem>>
    %146 = vector.broadcast %145 : f32 to vector<8x8xf32>
    %147 = arith.mulf %146, %30 : vector<8x8xf32>
    %148 = arith.addf %144, %147 : vector<8x8xf32>
    %c23 = arith.constant 23 : index
    %149 = memref.load %arg3[%c23] : memref<64xf32, #tpu.memory_space<smem>>
    %150 = vector.broadcast %149 : f32 to vector<8x8xf32>
    %151 = arith.mulf %150, %31 : vector<8x8xf32>
    %152 = arith.addf %148, %151 : vector<8x8xf32>
    %c24 = arith.constant 24 : index
    %153 = memref.load %arg3[%c24] : memref<64xf32, #tpu.memory_space<smem>>
    %154 = vector.broadcast %153 : f32 to vector<8x8xf32>
    %155 = arith.mulf %154, %34 : vector<8x8xf32>
    %156 = arith.addf %152, %155 : vector<8x8xf32>
    %c25 = arith.constant 25 : index
    %157 = memref.load %arg3[%c25] : memref<64xf32, #tpu.memory_space<smem>>
    %158 = vector.broadcast %157 : f32 to vector<8x8xf32>
    %159 = arith.mulf %158, %35 : vector<8x8xf32>
    %160 = arith.addf %156, %159 : vector<8x8xf32>
    %c26 = arith.constant 26 : index
    %161 = memref.load %arg3[%c26] : memref<64xf32, #tpu.memory_space<smem>>
    %162 = vector.broadcast %161 : f32 to vector<8x8xf32>
    %163 = arith.mulf %162, %38 : vector<8x8xf32>
    %164 = arith.addf %160, %163 : vector<8x8xf32>
    %c27 = arith.constant 27 : index
    %165 = memref.load %arg3[%c27] : memref<64xf32, #tpu.memory_space<smem>>
    %166 = vector.broadcast %165 : f32 to vector<8x8xf32>
    %167 = arith.mulf %166, %39 : vector<8x8xf32>
    %168 = arith.addf %164, %167 : vector<8x8xf32>
    %c28 = arith.constant 28 : index
    %169 = memref.load %arg3[%c28] : memref<64xf32, #tpu.memory_space<smem>>
    %170 = vector.broadcast %169 : f32 to vector<8x8xf32>
    %171 = arith.mulf %170, %42 : vector<8x8xf32>
    %172 = arith.addf %168, %171 : vector<8x8xf32>
    %c29 = arith.constant 29 : index
    %173 = memref.load %arg3[%c29] : memref<64xf32, #tpu.memory_space<smem>>
    %174 = vector.broadcast %173 : f32 to vector<8x8xf32>
    %175 = arith.mulf %174, %43 : vector<8x8xf32>
    %176 = arith.addf %172, %175 : vector<8x8xf32>
    %c30 = arith.constant 30 : index
    %177 = memref.load %arg3[%c30] : memref<64xf32, #tpu.memory_space<smem>>
    %178 = vector.broadcast %177 : f32 to vector<8x8xf32>
    %179 = arith.mulf %178, %46 : vector<8x8xf32>
    %180 = arith.addf %176, %179 : vector<8x8xf32>
    %c31 = arith.constant 31 : index
    %181 = memref.load %arg3[%c31] : memref<64xf32, #tpu.memory_space<smem>>
    %182 = vector.broadcast %181 : f32 to vector<8x8xf32>
    %183 = arith.mulf %182, %47 : vector<8x8xf32>
    %184 = arith.addf %180, %183 : vector<8x8xf32>
    %c1_55 = arith.constant 1 : index
    %185 = memref.load %arg4[%c1_55] : memref<4xf32, #tpu.memory_space<smem>>
    %186 = vector.broadcast %185 : f32 to vector<8x8xf32>
    %187 = arith.addf %184, %186 : vector<8x8xf32>
    %cst_56 = arith.constant 0.000000e+00 : f32
    %188 = vector.broadcast %cst_56 : f32 to vector<8x8xf32>
    %189 = arith.cmpf ogt, %187, %188 : vector<8x8xf32>
    %cst_57 = arith.constant 0.00999999977 : f32
    %190 = vector.broadcast %cst_57 : f32 to vector<8x8xf32>
    %191 = arith.mulf %190, %187 : vector<8x8xf32>
    %192 = arith.select %189, %187, %191 : vector<8x8xi1>, vector<8x8xf32>
    %c0_58 = arith.constant 0 : index
    %c1_59 = arith.constant 1 : index
    %c0_60 = arith.constant 0 : index
    %c0_61 = arith.constant 0 : index
    %193 = vector.load %arg5[%c0_58, %c1_59, %c0_60, %c0_61] : memref<1x4x8x8xf32, #tpu.memory_space<vmem>>, vector<1x1x8x8xf32>
    %194 = vector.shape_cast %193 : vector<1x1x8x8xf32> to vector<8x8xf32>
    %195 = vector.shape_cast %192 : vector<8x8xf32> to vector<1x1x8x8xf32>
    tpu.vector_store %arg5[%c0_58, %c1_59, %c0_60, %c0_61], %195 {strides = array<i32>} : memref<1x4x8x8xf32, #tpu.memory_space<vmem>>, vector<1x1x8x8xf32>,
    %c32 = arith.constant 32 : index
    %196 = memref.load %arg3[%c32] : memref<64xf32, #tpu.memory_space<smem>>
    %197 = vector.broadcast %196 : f32 to vector<8x8xf32>
    %198 = arith.mulf %197, %18 : vector<8x8xf32>
    %c33 = arith.constant 33 : index
    %199 = memref.load %arg3[%c33] : memref<64xf32, #tpu.memory_space<smem>>
    %200 = vector.broadcast %199 : f32 to vector<8x8xf32>
    %201 = arith.mulf %200, %19 : vector<8x8xf32>
    %202 = arith.addf %198, %201 : vector<8x8xf32>
    %c34 = arith.constant 34 : index
    %203 = memref.load %arg3[%c34] : memref<64xf32, #tpu.memory_space<smem>>
    %204 = vector.broadcast %203 : f32 to vector<8x8xf32>
    %205 = arith.mulf %204, %22 : vector<8x8xf32>
    %206 = arith.addf %202, %205 : vector<8x8xf32>
    %c35 = arith.constant 35 : index
    %207 = memref.load %arg3[%c35] : memref<64xf32, #tpu.memory_space<smem>>
    %208 = vector.broadcast %207 : f32 to vector<8x8xf32>
    %209 = arith.mulf %208, %23 : vector<8x8xf32>
    %210 = arith.addf %206, %209 : vector<8x8xf32>
    %c36 = arith.constant 36 : index
    %211 = memref.load %arg3[%c36] : memref<64xf32, #tpu.memory_space<smem>>
    %212 = vector.broadcast %211 : f32 to vector<8x8xf32>
    %213 = arith.mulf %212, %26 : vector<8x8xf32>
    %214 = arith.addf %210, %213 : vector<8x8xf32>
    %c37 = arith.constant 37 : index
    %215 = memref.load %arg3[%c37] : memref<64xf32, #tpu.memory_space<smem>>
    %216 = vector.broadcast %215 : f32 to vector<8x8xf32>
    %217 = arith.mulf %216, %27 : vector<8x8xf32>
    %218 = arith.addf %214, %217 : vector<8x8xf32>
    %c38 = arith.constant 38 : index
    %219 = memref.load %arg3[%c38] : memref<64xf32, #tpu.memory_space<smem>>
    %220 = vector.broadcast %219 : f32 to vector<8x8xf32>
    %221 = arith.mulf %220, %30 : vector<8x8xf32>
    %222 = arith.addf %218, %221 : vector<8x8xf32>
    %c39 = arith.constant 39 : index
    %223 = memref.load %arg3[%c39] : memref<64xf32, #tpu.memory_space<smem>>
    %224 = vector.broadcast %223 : f32 to vector<8x8xf32>
    %225 = arith.mulf %224, %31 : vector<8x8xf32>
    %226 = arith.addf %222, %225 : vector<8x8xf32>
    %c40 = arith.constant 40 : index
    %227 = memref.load %arg3[%c40] : memref<64xf32, #tpu.memory_space<smem>>
    %228 = vector.broadcast %227 : f32 to vector<8x8xf32>
    %229 = arith.mulf %228, %34 : vector<8x8xf32>
    %230 = arith.addf %226, %229 : vector<8x8xf32>
    %c41 = arith.constant 41 : index
    %231 = memref.load %arg3[%c41] : memref<64xf32, #tpu.memory_space<smem>>
    %232 = vector.broadcast %231 : f32 to vector<8x8xf32>
    %233 = arith.mulf %232, %35 : vector<8x8xf32>
    %234 = arith.addf %230, %233 : vector<8x8xf32>
    %c42 = arith.constant 42 : index
    %235 = memref.load %arg3[%c42] : memref<64xf32, #tpu.memory_space<smem>>
    %236 = vector.broadcast %235 : f32 to vector<8x8xf32>
    %237 = arith.mulf %236, %38 : vector<8x8xf32>
    %238 = arith.addf %234, %237 : vector<8x8xf32>
    %c43 = arith.constant 43 : index
    %239 = memref.load %arg3[%c43] : memref<64xf32, #tpu.memory_space<smem>>
    %240 = vector.broadcast %239 : f32 to vector<8x8xf32>
    %241 = arith.mulf %240, %39 : vector<8x8xf32>
    %242 = arith.addf %238, %241 : vector<8x8xf32>
    %c44 = arith.constant 44 : index
    %243 = memref.load %arg3[%c44] : memref<64xf32, #tpu.memory_space<smem>>
    %244 = vector.broadcast %243 : f32 to vector<8x8xf32>
    %245 = arith.mulf %244, %42 : vector<8x8xf32>
    %246 = arith.addf %242, %245 : vector<8x8xf32>
    %c45 = arith.constant 45 : index
    %247 = memref.load %arg3[%c45] : memref<64xf32, #tpu.memory_space<smem>>
    %248 = vector.broadcast %247 : f32 to vector<8x8xf32>
    %249 = arith.mulf %248, %43 : vector<8x8xf32>
    %250 = arith.addf %246, %249 : vector<8x8xf32>
    %c46 = arith.constant 46 : index
    %251 = memref.load %arg3[%c46] : memref<64xf32, #tpu.memory_space<smem>>
    %252 = vector.broadcast %251 : f32 to vector<8x8xf32>
    %253 = arith.mulf %252, %46 : vector<8x8xf32>
    %254 = arith.addf %250, %253 : vector<8x8xf32>
    %c47 = arith.constant 47 : index
    %255 = memref.load %arg3[%c47] : memref<64xf32, #tpu.memory_space<smem>>
    %256 = vector.broadcast %255 : f32 to vector<8x8xf32>
    %257 = arith.mulf %256, %47 : vector<8x8xf32>
    %258 = arith.addf %254, %257 : vector<8x8xf32>
    %c2_62 = arith.constant 2 : index
    %259 = memref.load %arg4[%c2_62] : memref<4xf32, #tpu.memory_space<smem>>
    %260 = vector.broadcast %259 : f32 to vector<8x8xf32>
    %261 = arith.addf %258, %260 : vector<8x8xf32>
    %cst_63 = arith.constant 0.000000e+00 : f32
    %262 = vector.broadcast %cst_63 : f32 to vector<8x8xf32>
    %263 = arith.cmpf ogt, %261, %262 : vector<8x8xf32>
    %cst_64 = arith.constant 0.00999999977 : f32
    %264 = vector.broadcast %cst_64 : f32 to vector<8x8xf32>
    %265 = arith.mulf %264, %261 : vector<8x8xf32>
    %266 = arith.select %263, %261, %265 : vector<8x8xi1>, vector<8x8xf32>
    %c0_65 = arith.constant 0 : index
    %c2_66 = arith.constant 2 : index
    %c0_67 = arith.constant 0 : index
    %c0_68 = arith.constant 0 : index
    %267 = vector.load %arg5[%c0_65, %c2_66, %c0_67, %c0_68] : memref<1x4x8x8xf32, #tpu.memory_space<vmem>>, vector<1x1x8x8xf32>
    %268 = vector.shape_cast %267 : vector<1x1x8x8xf32> to vector<8x8xf32>
    %269 = vector.shape_cast %266 : vector<8x8xf32> to vector<1x1x8x8xf32>
    tpu.vector_store %arg5[%c0_65, %c2_66, %c0_67, %c0_68], %269 {strides = array<i32>} : memref<1x4x8x8xf32, #tpu.memory_space<vmem>>, vector<1x1x8x8xf32>,
    %c48 = arith.constant 48 : index
    %270 = memref.load %arg3[%c48] : memref<64xf32, #tpu.memory_space<smem>>
    %271 = vector.broadcast %270 : f32 to vector<8x8xf32>
    %272 = arith.mulf %271, %18 : vector<8x8xf32>
    %c49 = arith.constant 49 : index
    %273 = memref.load %arg3[%c49] : memref<64xf32, #tpu.memory_space<smem>>
    %274 = vector.broadcast %273 : f32 to vector<8x8xf32>
    %275 = arith.mulf %274, %19 : vector<8x8xf32>
    %276 = arith.addf %272, %275 : vector<8x8xf32>
    %c50 = arith.constant 50 : index
    %277 = memref.load %arg3[%c50] : memref<64xf32, #tpu.memory_space<smem>>
    %278 = vector.broadcast %277 : f32 to vector<8x8xf32>
    %279 = arith.mulf %278, %22 : vector<8x8xf32>
    %280 = arith.addf %276, %279 : vector<8x8xf32>
    %c51 = arith.constant 51 : index
    %281 = memref.load %arg3[%c51] : memref<64xf32, #tpu.memory_space<smem>>
    %282 = vector.broadcast %281 : f32 to vector<8x8xf32>
    %283 = arith.mulf %282, %23 : vector<8x8xf32>
    %284 = arith.addf %280, %283 : vector<8x8xf32>
    %c52 = arith.constant 52 : index
    %285 = memref.load %arg3[%c52] : memref<64xf32, #tpu.memory_space<smem>>
    %286 = vector.broadcast %285 : f32 to vector<8x8xf32>
    %287 = arith.mulf %286, %26 : vector<8x8xf32>
    %288 = arith.addf %284, %287 : vector<8x8xf32>
    %c53 = arith.constant 53 : index
    %289 = memref.load %arg3[%c53] : memref<64xf32, #tpu.memory_space<smem>>
    %290 = vector.broadcast %289 : f32 to vector<8x8xf32>
    %291 = arith.mulf %290, %27 : vector<8x8xf32>
    %292 = arith.addf %288, %291 : vector<8x8xf32>
    %c54 = arith.constant 54 : index
    %293 = memref.load %arg3[%c54] : memref<64xf32, #tpu.memory_space<smem>>
    %294 = vector.broadcast %293 : f32 to vector<8x8xf32>
    %295 = arith.mulf %294, %30 : vector<8x8xf32>
    %296 = arith.addf %292, %295 : vector<8x8xf32>
    %c55 = arith.constant 55 : index
    %297 = memref.load %arg3[%c55] : memref<64xf32, #tpu.memory_space<smem>>
    %298 = vector.broadcast %297 : f32 to vector<8x8xf32>
    %299 = arith.mulf %298, %31 : vector<8x8xf32>
    %300 = arith.addf %296, %299 : vector<8x8xf32>
    %c56 = arith.constant 56 : index
    %301 = memref.load %arg3[%c56] : memref<64xf32, #tpu.memory_space<smem>>
    %302 = vector.broadcast %301 : f32 to vector<8x8xf32>
    %303 = arith.mulf %302, %34 : vector<8x8xf32>
    %304 = arith.addf %300, %303 : vector<8x8xf32>
    %c57 = arith.constant 57 : index
    %305 = memref.load %arg3[%c57] : memref<64xf32, #tpu.memory_space<smem>>
    %306 = vector.broadcast %305 : f32 to vector<8x8xf32>
    %307 = arith.mulf %306, %35 : vector<8x8xf32>
    %308 = arith.addf %304, %307 : vector<8x8xf32>
    %c58 = arith.constant 58 : index
    %309 = memref.load %arg3[%c58] : memref<64xf32, #tpu.memory_space<smem>>
    %310 = vector.broadcast %309 : f32 to vector<8x8xf32>
    %311 = arith.mulf %310, %38 : vector<8x8xf32>
    %312 = arith.addf %308, %311 : vector<8x8xf32>
    %c59 = arith.constant 59 : index
    %313 = memref.load %arg3[%c59] : memref<64xf32, #tpu.memory_space<smem>>
    %314 = vector.broadcast %313 : f32 to vector<8x8xf32>
    %315 = arith.mulf %314, %39 : vector<8x8xf32>
    %316 = arith.addf %312, %315 : vector<8x8xf32>
    %c60 = arith.constant 60 : index
    %317 = memref.load %arg3[%c60] : memref<64xf32, #tpu.memory_space<smem>>
    %318 = vector.broadcast %317 : f32 to vector<8x8xf32>
    %319 = arith.mulf %318, %42 : vector<8x8xf32>
    %320 = arith.addf %316, %319 : vector<8x8xf32>
    %c61 = arith.constant 61 : index
    %321 = memref.load %arg3[%c61] : memref<64xf32, #tpu.memory_space<smem>>
    %322 = vector.broadcast %321 : f32 to vector<8x8xf32>
    %323 = arith.mulf %322, %43 : vector<8x8xf32>
    %324 = arith.addf %320, %323 : vector<8x8xf32>
    %c62 = arith.constant 62 : index
    %325 = memref.load %arg3[%c62] : memref<64xf32, #tpu.memory_space<smem>>
    %326 = vector.broadcast %325 : f32 to vector<8x8xf32>
    %327 = arith.mulf %326, %46 : vector<8x8xf32>
    %328 = arith.addf %324, %327 : vector<8x8xf32>
    %c63 = arith.constant 63 : index
    %329 = memref.load %arg3[%c63] : memref<64xf32, #tpu.memory_space<smem>>
    %330 = vector.broadcast %329 : f32 to vector<8x8xf32>
    %331 = arith.mulf %330, %47 : vector<8x8xf32>
    %332 = arith.addf %328, %331 : vector<8x8xf32>
    %c3_69 = arith.constant 3 : index
    %333 = memref.load %arg4[%c3_69] : memref<4xf32, #tpu.memory_space<smem>>
    %334 = vector.broadcast %333 : f32 to vector<8x8xf32>
    %335 = arith.addf %332, %334 : vector<8x8xf32>
    %cst_70 = arith.constant 0.000000e+00 : f32
    %336 = vector.broadcast %cst_70 : f32 to vector<8x8xf32>
    %337 = arith.cmpf ogt, %335, %336 : vector<8x8xf32>
    %cst_71 = arith.constant 0.00999999977 : f32
    %338 = vector.broadcast %cst_71 : f32 to vector<8x8xf32>
    %339 = arith.mulf %338, %335 : vector<8x8xf32>
    %340 = arith.select %337, %335, %339 : vector<8x8xi1>, vector<8x8xf32>
    %c0_72 = arith.constant 0 : index
    %c3_73 = arith.constant 3 : index
    %c0_74 = arith.constant 0 : index
    %c0_75 = arith.constant 0 : index
    %341 = vector.load %arg5[%c0_72, %c3_73, %c0_74, %c0_75] : memref<1x4x8x8xf32, #tpu.memory_space<vmem>>, vector<1x1x8x8xf32>
    %342 = vector.shape_cast %341 : vector<1x1x8x8xf32> to vector<8x8xf32>
    %343 = vector.shape_cast %340 : vector<8x8xf32> to vector<1x1x8x8xf32>
    tpu.vector_store %arg5[%c0_72, %c3_73, %c0_74, %c0_75], %343 {strides = array<i32>} : memref<1x4x8x8xf32, #tpu.memory_space<vmem>>, vector<1x1x8x8xf32>,
    return
  }
  func.func @transform_0(%arg0: i32, %arg1: i32) -> (i32, i32, i32, i32) {
    %c0_i32 = arith.constant 0 : i32
    %c0_i32_0 = arith.constant 0 : i32
    %c0_i32_1 = arith.constant 0 : i32
    return %arg0, %c0_i32, %arg1, %c0_i32_0 : i32, i32, i32, i32
  }
  func.func @transform_1(%arg0: i32, %arg1: i32) -> i32 {
    %c0_i32 = arith.constant 0 : i32
    %c0_i32_0 = arith.constant 0 : i32
    return %c0_i32 : i32
  }
  func.func @transform_2(%arg0: i32, %arg1: i32) -> i32 {
    %c0_i32 = arith.constant 0 : i32
    %c0_i32_0 = arith.constant 0 : i32
    return %c0_i32 : i32
  }
  func.func @transform_3(%arg0: i32, %arg1: i32) -> (i32, i32, i32, i32) {
    %c0_i32 = arith.constant 0 : i32
    %c0_i32_0 = arith.constant 0 : i32
    %c0_i32_1 = arith.constant 0 : i32
    return %arg0, %c0_i32, %arg1, %c0_i32_0 : i32, i32, i32, i32
  }
}

</mosaic_0001>

<bundles_post_ra>
// kernel: pool_block_forward.1
= control target key start
LH: loop header
LB: loop body
LE: loop exit
PB: predicated region body
PF: predicated region fallthrough
CT: control target
= control target key end

     0   :  { %8 = vsyncpa [#allocation4], 0  ;;  %s10701_s0 = inlined_call_operand.vmem [shape: f32[2,4,8,32], index: 0, kind: input, shape index: {}]   ;;  %s10702_s1 = inlined_call_operand.vmem [shape: f32[64], index: 1, kind: input, shape index: {}]   ;;  %s10703_s2 = inlined_call_operand.vmem [shape: f32[4], index: 2, kind: input, shape index: {}]   ;;  %s10704_s3 = inlined_call_operand.hbm [shape: f32[2,4,8,8], index: 3, kind: output, shape index: {}]  }
   0x1   :  { %9 = vsyncpa [#allocation6], 0 }
   0x2   :  { %10 = vsyncpa [#allocation3], 0 }
   0x3   :  { %12 = vsyncpa [#allocation3 + $0x1], 0  ;;  %s9849_s12 = smov 0   ;;  %s9851_s13 = smov 0  }
   0x4   :  { %s9853_s14 = smov 0   ;;  %s9855_s15 = smov 0  }
   0x5   :  { %s9857_s16 = smov 0   ;;  %s9859_s17 = smov 0  }
   0x6 LB: > { %s8019_s18 = sadd.s32 4294967295, %s9817_s17   ;;  %s8020_s19 = sadd.s32 4294967294, %s9817_s17   ;;  %s9817_s17 = sphi %s9859_s17, %s18_s17   ;;  %s9813_s16 = sphi %s9857_s16, %s10726_s16   ;;  %s9809_s15 = sphi %s9855_s15, %s10725_s15   ;;  %s9805_s14 = sphi %s9853_s14, %s10724_s14   ;;  %s9801_s13 = sphi %s9851_s13, %s10723_s13   ;;  %s9797_s12 = sphi %s9849_s12, %s10722_s12  }
   0x7   : > { %s30_s20 = sadd.s32 1, %s9813_s16  ;;  %s109_s21 = sadd.s32 1, %s9805_s14 }
   0x8   : > { %p32_p0 = scmp.ge.s32.totalorder %s30_s20, 2  ;;  %p119_p1 = scmp.ne.s32.totalorder %s9805_s14, %s9801_s13 }
   0x9   : > { %p120_p2 = scmp.eq.s32.totalorder %s8019_s18, 1  ;;  %p125_p3 = scmp.ne.s32.totalorder %s9801_s13, %s9797_s12 }
   0xa   : > { %s10728_s20 = smov (%p32_p0, %s30_s20), 0  ;;  %p126_p5 = scmp.eq.s32.totalorder %s8020_s19, 1 }
   0xb   : > { %p9889_p4 = por %p120_p2, %p119_p1  ;;  %s104_s23 = ssub.s32 %s9813_s16, %s10728_s20 }
   0xc   : > { %p8021_p6 = scmp.ge.s32.totalorder %s9817_s17, 1  ;;  %p107_p7 = scmp.eq.s32.totalorder %s104_s23, 0 }
   0xd   : > { %s10709_s22 = scalar_select %p9889_p4, 1, 0 }
   0xe   : > { %p9896_p8 = por %p126_p5, %p125_p3  ;;  %p133_p9 = scmp.lt.s32.totalorder %s9817_s17, 3 }
   0xf   : > { %s9902_s25 = scalar_select %p107_p7, %s9805_s14, %s109_s21  }
  0x10   : > { %s10710_s24 = scalar_select %p9896_p8, 1, 0 }
  0x11   : > { %p9904_p10 = pnand %p8021_p6, %p133_p9  ;;  %p9908_p11 = scmp.eq.s32.totalorder %s8019_s18, 0 }
  0x12   : > { %s146_s30 = sshll.u32 %s10702_s1, 4  ;;  %s157_s6 = sshll.u32 %s10703_s2, 4  ;;  %s147_s30 = int_to_ptr.vmem [resolvable:$true] %s146_s30  ;;  %s158_s6 = int_to_ptr.vmem [resolvable:$true] %s157_s6 }
  0x13   : > { %s10711_s26 = scalar_select %p9904_p10, 1, 0 }
  0x14   : > { %s10712_s27 = scalar_select %p9908_p11, 1, 0 }
  0x15   : > { %p9628_p12 = pneg %p9904_p10  ;;  %s9701_s8 = scalar_lea.vmem %s147_s30, 16 }
  0x16   : > { %p9702_p0 = scmp.ne.s32.totalorder %s147_s30, %s9701_s8  ;;  %p9709_p5 = scmp.lt.s32.totalorder %s147_s30, %s147_s30 }
  0x17   : > { %p9922_p13 = pnand %p9908_p11, %p9628_p12  ;;  %p9710_p6 = scmp.lt.s32.totalorder %s9701_s8, %s9701_s8 }
  0x19   : > { %p9703_p1 = pneg %p9922_p13  ;;  %p9711_p7 = por %p9710_p6, %p9709_p5 }
  0x1b   : > { %p9704_p2 = pnand %p9703_p1, %p9702_p0 }
  0x1d   : > { %p9705_p3 = pneg %p9704_p2 }
  0x1f   : > { %p9712_p9 = pnand %p9711_p7, %p9705_p3 }
  0x21   : > { %9715 = shalt.err (!%p9712_p9)
}
  0x22   : > { %s9819_s9 = smov [#allocation2]   ;;  %s9716_s10 = scalar_lea.vmem %s158_s6, 16 }
  0x23   : > { %9631 = dma.vmem_to_smem (!%p9922_p13), %s147_s30, 16, %s9819_s9, [#allocation4]  }
  0x24   : > { %p9717_p12 = scmp.ne.s32.totalorder %s158_s6, %s9716_s10  ;;  %p9724_p11 = scmp.lt.s32.totalorder %s158_s6, %s158_s6 }
  0x25   : > { %p9725_p10 = scmp.lt.s32.totalorder %s9716_s10, %s9716_s10 }
  0x26   : > { %p9719_p8 = pnand %p9717_p12, %p9703_p1 }
  0x27   : > { %p9726_p0 = por %p9725_p10, %p9724_p11 }
  0x28   : > { %p9720_p4 = pneg %p9719_p8 }
  0x2a   : > { %p9727_p2 = pnand %p9726_p0, %p9720_p4 }
  0x2c   : > { %9730 = shalt.err (!%p9727_p2)
}
  0x2d   : > { %s9820_s11 = smov [#allocation5]   ;;  %p10714_p3 = scmp.ne.s32.totalorder %s10711_s26, 0 }
  0x2e   : > { %9634 = dma.vmem_to_smem (!%p9922_p13), %s158_s6, 16, %s9820_s11, [#allocation6]  }
  0x2f   : > { %181 = sbr.rel (%p10714_p3) target bundleno = 736 (0x2e0), region = 32  ;;  %p10715_p5 = scmp.ne.s32.totalorder (!%p10714_p3), %s10712_s27, 0 }
  0x36   : > { %9784 = dma.done.wait (%p10715_p5), [#allocation4], 16  }
  0x37   : > { %9786 = vsyncadd (%p10715_p5), [#allocation4], 4294967280 }
  0x38   : > { %9788 = dma.done.wait (%p10715_p5), [#allocation6], 16  }
  0x39   : > { %9790 = vsyncadd (%p10715_p5), [#allocation6], 4294967280 }
  0x3a   : > { %191 = sfence }
  0x3b   : > { %p213_p4 = scmp.lt.s32.totalorder %s9809_s15, 1  ;;  %v221_v0 = vlaneseq  ;;  %v9821_v1 = vmov 0.0|0.0   ;;  %vm9822_vm0 = vmmov 0   ;;  %v9823_v4 = vmov 0.0   ;;  %s9824_s27 = smov 112  }
  0x3c   : > { %9170 = vmatprep.subr.bf16.mxu0 %v9821_v1  ;;  %9188 = vmatprep.subr.bf16.mxu1 %v9821_v1  ;;  %vm241_vm1 = vcmask 130048   ;;  %v9825_v14 = vmov 1.0|1.0   ;;  %s10274_s28 = sld [smem:[#allocation2]]  ;;  %s10282_s5 = sld [smem:[#allocation2 + $0x1]]  ;;  %vm7689_vm8 = vcmask 64512  }
  0x3d   : > { %s214_s18 = scalar_select %p213_p4, %s9809_s15, 1  ;;  %v222_v2 = vshrl.u32 %v221_v0, 7  ;;  %v225_v3 = vand.u32 127, %v221_v0  ;;  %8502 = vmatprep.mubr.msk.f32.mxu0 %vm9822_vm0, %v9823_v4  ;;  %8544 = vmatprep.mubr.msk.f32.mxu1 %vm9822_vm0, %v9823_v4 }
  0x3e   : > { %s10276_s29 = sld [smem:[#allocation2 + $0x10]]  ;;  %s10284_s6 = sld [smem:[#allocation2 + $0x11]] }
  0x3f   : > { %s8208_s19 = sshll.u32 %s214_s18, 5  ;;  %v223_v5 = vadd.s32 8, %v222_v2  ;;  %v226_v6 = vmul.u32 2, %v225_v3  ;;  %s10278_s30 = sld [smem:[#allocation2 + $0x20]] }
  0x40   : > { %s9953_s26 = scalar_lea.vmem %s10701_s0, %s8208_s19  ;;  %s10280_s4 = sld [smem:[#allocation2 + $0x30]] }
  0x41   : > { %v240_v7 = vld [vmem:[%s9953_s26] sm:$0xff]  ;;  %vm227_vm2 = vcmp.eq.s32.totalorder %v222_v2, %v226_v6  ;;  %vm228_vm3 = vcmp.eq.s32.totalorder %v223_v5, %v226_v6  ;;  %v233_v8 = vadd.s32 1, %v226_v6  ;;  %v9970_v16 = vld [vmem:[%s9953_s26 + $0x8] sm:$0xff]  ;;  %v10045_v45 = vld [vmem:[%s9953_s26 + $0x10] sm:$0xff]  ;;  %s10286_s7 = sld [smem:[#allocation2 + $0x21]]  ;;  %s8135_s9 = sld [smem:[#allocation2 + $0x2]] }
  0x42   : > { %1163 = vrot.lane.b32.xlu0 %v240_v7, %s9824_s27  ;;  %v243_v9 = vsel %vm241_vm1, %v240_v7, 0  ;;  %vm9958_vm4 = vmpackc.low %vm228_vm3, %vm227_vm2  ;;  %v8031_v11 = vsel %vm227_vm2, 1.0, %v9823_v4  ;;  %v8032_v12 = vsel %vm228_vm3, 1.0, %v9823_v4  ;;  %4853 = vrot.lane.b32.xlu1 %v10045_v45, %s9824_s27  ;;  %v10079_v53 = vld [vmem:[%s9953_s26 + $0x18] sm:$0xff]  ;;  %v2088_v54 = vsel %vm241_vm1, %v9970_v16, 0  ;;  %s10288_s8 = sld [smem:[#allocation2 + $0x31]] }
  0x43   : > { %v9964_v13 = vand.u32 4294901760, %v243_v9  ;;  %9172 = vmatpush3.bf16.msk.msra.mxu0 %vm9958_vm4, %v9825_v14  ;;  %vm234_vm5 = vcmp.eq.s32.totalorder %v222_v2, %v233_v8  ;;  %vm235_vm6 = vcmp.eq.s32.totalorder %v223_v5, %v233_v8  ;;  %v324_v15 = vsub.f32 %v8031_v11, %v8031_v11  ;;  %s8151_s10 = sld [smem:[#allocation2 + $0x12]]  ;;  %s10496_s19 = sld [smem:[#allocation2 + $0x3]] }
  0x44   : > { %vm9972_vm7 = vmpackc.low %vm235_vm6, %vm234_vm5  ;;  %9173 = vmatprep.subr.bf16.mxu0 %v9821_v1  ;;  %v331_v18 = vsub.f32 %v8032_v12, %v8032_v12  ;;  %v8033_v19 = vsel %vm234_vm5, 1.0, %v9823_v4  ;;  %v8034_v20 = vsel %vm235_vm6, 1.0, %v9823_v4  ;;  %v10105_v55 = vand.u32 4294901760, %v2088_v54  ;;  %s8169_s11 = sld [smem:[#allocation2 + $0x22]]  ;;  %s10498_s21 = sld [smem:[#allocation2 + $0x13]] }
  0x45   : > { %v313_v21 = vsub.f32 %v243_v9, %v9964_v13  ;;  %9190 = vmatpush3.bf16.msk.msra.mxu1 %vm9972_vm7, %v9825_v14  ;;  %v325_v22 = vand.u32 4294901760, %v324_v15  ;;  %v783_v23 = vsub.f32 %v8033_v19, %v8033_v19  ;;  %v790_v24 = vsub.f32 %v8034_v20, %v8034_v20  ;;  %s8187_s18 = sld [smem:[#allocation2 + $0x32]]  ;;  %s10500_s23 = sld [smem:[#allocation2 + $0x23]] }
  0x46   : > { %v332_v25 = vand.u32 4294901760, %v331_v18  ;;  %9191 = vmatprep.subr.bf16.mxu1 %v9821_v1  ;;  %3008 = vrot.lane.b32.xlu0 %v9970_v16, %s9824_s27  ;;  %v9998_v41 = vpack.c.bf16 %v331_v18, %v324_v15  ;;  %v2158_v56 = vsub.f32 %v2088_v54, %v10105_v55  ;;  %v3933_v5 = vsel %vm241_vm1, %v10045_v45, 0  ;;  %s10502_s26 = sld [smem:[#allocation2 + $0x33]]  ;;  %p10720_p10 = scmp.ne.s32.totalorder %s10709_s22, 0 }
  0x47   : > { %v314_v26 = vand.u32 4294901760, %v313_v21  ;;  %v326_v27 = vsub.f32 %v324_v15, %v325_v22  ;;  %v784_v28 = vand.u32 4294901760, %v783_v23  ;;  %v791_v29 = vand.u32 4294901760, %v790_v24  ;;  %6698 = vrot.lane.b32.xlu1 %v10079_v53, %s9824_s27  ;;  %s8137_s27 = sld [smem:[#allocation2 + $0x4]] }
  0x48   : > { %v333_v30 = vsub.f32 %v331_v18, %v332_v25  ;;  %v10000_v42 = vpack.c.bf16 %v790_v24, %v783_v23  ;;  %v10024_v43 = vpack.c.bf16 %v332_v25, %v325_v22  ;;  %v2159_v57 = vand.u32 4294901760, %v2158_v56 }
  0x49   : > { %v315_v31 = vsub.f32 %v313_v21, %v314_v26  ;;  %v327_v32 = vand.u32 4294901760, %v326_v27  ;;  %v785_v33 = vsub.f32 %v783_v23, %v784_v28  ;;  %v792_v34 = vsub.f32 %v790_v24, %v791_v29 }
  0x4a   : > { %v334_v35 = vand.u32 4294901760, %v333_v30  ;;  %v10026_v44 = vpack.c.bf16 %v791_v29, %v784_v28  ;;  %v2160_v58 = vsub.f32 %v2158_v56, %v2159_v57  ;;  %v10242_v6 = vand.u32 4294901760, %v3933_v5 }
  0x4b   : > { %v316_v36 = vand.u32 4294901760, %v315_v31  ;;  %v786_v37 = vand.u32 4294901760, %v785_v33  ;;  %v793_v38 = vand.u32 4294901760, %v792_v34  ;;  %v7621_v12 = vstv %s10274_s28  ;;  %s8153_s28 = sld [smem:[#allocation2 + $0x14]] }
  0x4c   : > { %v9986_v39 = vpack.c.bf16 %v334_v35, %v327_v32  ;;  %v2161_v59 = vand.u32 4294901760, %v2160_v58  ;;  %v10253_v7 = vsub.f32 %v3933_v5, %v10242_v6  ;;  %v7763_v15 = vstv %s10278_s30  ;;  %s8189_s30 = sld [smem:[#allocation2 + $0x34]] }
  0x4d   : > { %8503 = vmatmul.mubr.f32.vlgmr.msra.gmra.mrb[0].mxu0 %v316_v36  ;;  %8545 = vmatmul.mubr.f32.vlgmr.msra.gmra.mrb[0].mxu1 %v316_v36  ;;  %v9988_v40 = vpack.c.bf16 %v793_v38, %v786_v37  ;;  %v7834_v16 = vstv %s10280_s4  ;;  %v7624_v18 = vstv %s10282_s5  ;;  %v7695_v19 = vstv %s10284_s6  ;;  %s8138_s4 = sld [smem:[#allocation2 + $0x5]] }
  0x4e   : > { %9175 = vmatpush3.bf16.msra.mxu0 %v9986_v39  ;;  %8509 = vmatprep.mubr.msk.f32.mxu0 %vm9822_vm0, %v9823_v4  ;;  %v10256_v8 = vand.u32 4294901760, %v10253_v7  ;;  %v7766_v20 = vstv %s10286_s7  ;;  %v7774_v5 = vstv %s10500_s23  ;;  %s8154_s5 = sld [smem:[#allocation2 + $0x15]]  ;;  %s8192_s23 = sld [smem:[#allocation2 + $0x37]] }
  0x4f   : > { %9193 = vmatpush3.bf16.msra.mxu1 %v9988_v40  ;;  %8551 = vmatprep.mubr.msk.f32.mxu1 %vm9822_vm0, %v9823_v4  ;;  %s8172_s6 = sld [smem:[#allocation2 + $0x25]] }
  0x50   : > { %9176 = vmatprep.subr.bf16.mxu0 %v9821_v1  ;;  %9194 = vmatprep.subr.bf16.mxu1 %v9821_v1  ;;  %v4005_v9 = vsub.f32 %v10253_v7, %v10256_v8  ;;  %s8190_s7 = sld [smem:[#allocation2 + $0x35]] }
  0x52   : > { %v4006_v11 = vand.u32 4294901760, %v4005_v9 }
  0x55   : > { %8510 = vmatmul.mubr.f32.vlgmr.msra.gmra.mrb[0].mxu0 %v9964_v13  ;;  %8552 = vmatmul.mubr.f32.vlgmr.msra.gmra.mrb[0].mxu1 %v9964_v13 }
  0x56   : > { %9178 = vmatpush3.bf16.msra.mxu0 %v9998_v41  ;;  %9196 = vmatpush3.bf16.msra.mxu1 %v10000_v42 }
  0x57   : > { %8516 = vmatprep.mubr.msk.f32.mxu0 %vm9822_vm0, %v9823_v4  ;;  %8558 = vmatprep.mubr.msk.f32.mxu1 %vm9822_vm0, %v9823_v4 }
  0x58   : > { %9179 = vmatprep.subr.bf16.mxu0 %v9821_v1  ;;  %9197 = vmatprep.subr.bf16.mxu1 %v9821_v1 }
  0x5d   : > { %8517 = vmatmul.mubr.f32.vlgmr.msra.gmra.mrb[0].mxu0 %v313_v21  ;;  %8559 = vmatmul.mubr.f32.vlgmr.msra.gmra.mrb[0].mxu1 %v313_v21  ;;  %v7837_v21 = vstv %s10288_s8  ;;  %s8139_s8 = sld [smem:[#allocation2 + $0x6]] }
  0x5e   : > { %9181 = vmatpush3.bf16.msk.msra.mxu0 %vm9958_vm4, %v9825_v14  ;;  %9199 = vmatpush3.bf16.msk.msra.mxu1 %vm9972_vm7, %v9825_v14 }
  0x5f   : > { %8523 = vmatprep.mubr.msk.f32.mxu0 %vm9822_vm0, %v9823_v4  ;;  %8565 = vmatprep.mubr.msk.f32.mxu1 %vm9822_vm0, %v9823_v4 }
  0x60   : > { %9182 = vmatprep.subr.bf16.mxu0 %v9821_v1  ;;  %9200 = vmatprep.subr.bf16.mxu1 %v9821_v1 }
  0x65   : > { %8524 = vmatmul.mubr.f32.vlgmr.msra.gmra.mrb[0].mxu0 %v314_v26  ;;  %8566 = vmatmul.mubr.f32.vlgmr.msra.gmra.mrb[0].mxu1 %v314_v26 }
  0x66   : > { %9184 = vmatpush3.bf16.msra.mxu0 %v10024_v43  ;;  %9202 = vmatpush3.bf16.msra.mxu1 %v10026_v44 }
  0x67   : > { %8530 = vmatprep.mubr.msk.f32.mxu0 %vm9822_vm0, %v9823_v4  ;;  %8572 = vmatprep.mubr.msk.f32.mxu1 %vm9822_vm0, %v9823_v4 }
  0x68   : > { %9185 = vmatprep.subr.bf16.mxu0 %v9821_v1  ;;  %9203 = vmatprep.subr.bf16.mxu1 %v9821_v1 }
  0x6d   : > { %8531 = vmatmul.mubr.f32.vlgmr.msra.gmra.mrb[0].mxu0 %v9964_v13  ;;  %8573 = vmatmul.mubr.f32.vlgmr.msra.gmra.mrb[0].mxu1 %v9964_v13 }
  0x6e   : > { %9187 = vmatpush3.bf16.msk.msra.mxu0 %vm9958_vm4, %v9825_v14  ;;  %9205 = vmatpush3.bf16.msk.msra.mxu1 %vm9972_vm7, %v9825_v14 }
  0x6f   : > { %8537 = vmatprep.mubr.msk.f32.mxu0 %vm9822_vm0, %v9823_v4  ;;  %8579 = vmatprep.mubr.msk.f32.mxu1 %vm9822_vm0, %v9823_v4 }
  0x70   : > { %9206 = vmatprep.subr.bf16.mxu0 %v9821_v1  ;;  %9224 = vmatprep.subr.bf16.mxu1 %v9821_v1 }
  0x75   : > { %8538 = vmatmul.mubr.f32.vlgmr.msra.gmra.mrb[0].mxu0 %v9964_v13  ;;  %8580 = vmatmul.mubr.f32.vlgmr.msra.gmra.mrb[0].mxu1 %v9964_v13  ;;  %v7692_v13 = vstv %s10276_s29  ;;  %s8171_s29 = sld [smem:[#allocation2 + $0x24]] }
  0x76   : > { %9208 = vmatpush3.bf16.msk.msra.mxu0 %vm9958_vm4, %v9825_v14  ;;  %9226 = vmatpush3.bf16.msk.msra.mxu1 %vm9972_vm7, %v9825_v14 }
  0x77   : > { %8586 = vmatprep.mubr.msk.f32.mxu0 %vm9822_vm0, %v9823_v4  ;;  %9209 = vmatprep.subr.bf16.mxu0 %v9821_v1 }
  0x78   : > { %8628 = vmatprep.mubr.msk.f32.mxu1 %vm9822_vm0, %v9823_v4  ;;  %9227 = vmatprep.subr.bf16.mxu1 %v9821_v1 }
  0xb4   : > { %v1164_v46 = vpop.permute.xlu0 %1163  ;;  %v4854_v38 = vpop.permute.xlu1 %4853 }
  0xb5   : > { %v1165_v47 = vsel %vm241_vm1, %v1164_v46, 0  ;;  %v4855_v45 = vsel %vm241_vm1, %v4854_v38, 0 }
  0xb6   : > { %v1234_v48 = vand.u32 4294901760, %v1165_v47  ;;  %v10357_v46 = vand.u32 4294901760, %v4855_v45 }
  0xb8   : > { %v1235_v49 = vsub.f32 %v1165_v47, %v1234_v48  ;;  %v3009_v60 = vpop.permute.xlu0 %3008  ;;  %v4925_v47 = vsub.f32 %v4855_v45, %v10357_v46 }
  0xb9   : > { %v3010_v61 = vsel %vm241_vm1, %v3009_v60, 0 }
  0xba   : > { %v1236_v50 = vand.u32 4294901760, %v1235_v49  ;;  %v10173_v62 = vand.u32 4294901760, %v3010_v61 }
  0xbc   : > { %v1237_v51 = vsub.f32 %v1235_v49, %v1236_v50  ;;  %v3080_v63 = vsub.f32 %v3010_v61, %v10173_v62  ;;  %v7628_v61 = vstv %s8135_s9  ;;  %s8155_s9 = sld [smem:[#allocation2 + $0x16]] }
  0xbe   : > { %v1238_v52 = vand.u32 4294901760, %v1237_v51  ;;  %v3081_v0 = vand.u32 4294901760, %v3080_v63  ;;  %v5778_v51 = vsel %vm241_vm1, %v10079_v53, 0 }
  0xc0   : > { %8587 = vmatmul.mubr.f32.vlgmr.msra.gmra.mrb[2].mxu0 %v1238_v52  ;;  %8629 = vmatmul.mubr.f32.vlgmr.msra.gmra.mrb[2].mxu1 %v1238_v52  ;;  %v3082_v2 = vsub.f32 %v3080_v63, %v3081_v0  ;;  %v10426_v52 = vand.u32 4294901760, %v5778_v51 }
  0xc1   : > { %9211 = vmatpush3.bf16.msra.mxu0 %v9986_v39  ;;  %9229 = vmatpush3.bf16.msra.mxu1 %v9988_v40 }
  0xc2   : > { %8593 = vmatprep.mubr.msk.f32.mxu0 %vm9822_vm0, %v9823_v4  ;;  %9212 = vmatprep.subr.bf16.mxu0 %v9821_v1  ;;  %v3083_v3 = vand.u32 4294901760, %v3082_v2  ;;  %v5848_v53 = vsub.f32 %v5778_v51, %v10426_v52  ;;  %v7632_v2 = vstv %s10496_s19  ;;  %s8156_s19 = sld [smem:[#allocation2 + $0x17]]  ;;  %v7715_v17 = vstv %s8155_s9  ;;  %s8177_s9 = sld [smem:[#allocation2 + $0x2a]] }
  0xc3   : > { %8635 = vmatprep.mubr.msk.f32.mxu1 %vm9822_vm0, %v9823_v4  ;;  %9230 = vmatprep.subr.bf16.mxu1 %v9821_v1 }
  0xc4   : > { %v5849_v54 = vand.u32 4294901760, %v5848_v53 }
  0xc8   : > { %8594 = vmatmul.mubr.f32.vlgmr.msra.gmra.mrb[2].mxu0 %v1234_v48  ;;  %8636 = vmatmul.mubr.f32.vlgmr.msra.gmra.mrb[2].mxu1 %v1234_v48 }
  0xc9   : > { %9214 = vmatpush3.bf16.msra.mxu0 %v9998_v41  ;;  %9232 = vmatpush3.bf16.msra.mxu1 %v10000_v42 }
  0xca   : > { %8600 = vmatprep.mubr.msk.f32.mxu0 %vm9822_vm0, %v9823_v4  ;;  %9215 = vmatprep.subr.bf16.mxu0 %v9821_v1 }
  0xcb   : > { %8642 = vmatprep.mubr.msk.f32.mxu1 %vm9822_vm0, %v9823_v4  ;;  %9233 = vmatprep.subr.bf16.mxu1 %v9821_v1 }
  0xd0   : > { %8601 = vmatmul.mubr.f32.vlgmr.msra.gmra.mrb[2].mxu0 %v1235_v49  ;;  %8643 = vmatmul.mubr.f32.vlgmr.msra.gmra.mrb[2].mxu1 %v1235_v49 }
  0xd1   : > { %9217 = vmatpush3.bf16.msk.msra.mxu0 %vm9958_vm4, %v9825_v14  ;;  %9235 = vmatpush3.bf16.msk.msra.mxu1 %vm9972_vm7, %v9825_v14 }
  0xd2   : > { %8607 = vmatprep.mubr.msk.f32.mxu0 %vm9822_vm0, %v9823_v4  ;;  %9218 = vmatprep.subr.bf16.mxu0 %v9821_v1 }
  0xd3   : > { %8649 = vmatprep.mubr.msk.f32.mxu1 %vm9822_vm0, %v9823_v4  ;;  %9236 = vmatprep.subr.bf16.mxu1 %v9821_v1 }
  0xd8   : > { %8608 = vmatmul.mubr.f32.vlgmr.msra.gmra.mrb[2].mxu0 %v1236_v50  ;;  %8650 = vmatmul.mubr.f32.vlgmr.msra.gmra.mrb[2].mxu1 %v1236_v50 }
  0xd9   : > { %9220 = vmatpush3.bf16.msra.mxu0 %v10024_v43  ;;  %9238 = vmatpush3.bf16.msra.mxu1 %v10026_v44 }
  0xda   : > { %8614 = vmatprep.mubr.msk.f32.mxu0 %vm9822_vm0, %v9823_v4  ;;  %9221 = vmatprep.subr.bf16.mxu0 %v9821_v1 }
  0xdb   : > { %8656 = vmatprep.mubr.msk.f32.mxu1 %vm9822_vm0, %v9823_v4  ;;  %9239 = vmatprep.subr.bf16.mxu1 %v9821_v1 }
  0xe0   : > { %8615 = vmatmul.mubr.f32.vlgmr.msra.gmra.mrb[2].mxu0 %v1234_v48  ;;  %8657 = vmatmul.mubr.f32.vlgmr.msra.gmra.mrb[2].mxu1 %v1234_v48 }
  0xe1   : > { %9223 = vmatpush3.bf16.msk.msra.mxu0 %vm9958_vm4, %v9825_v14  ;;  %9241 = vmatpush3.bf16.msk.msra.mxu1 %vm9972_vm7, %v9825_v14 }
  0xe2   : > { %8621 = vmatprep.mubr.msk.f32.mxu0 %vm9822_vm0, %v9823_v4  ;;  %8663 = vmatprep.mubr.msk.f32.mxu1 %vm9822_vm0, %v9823_v4 }
  0xe3   : > { %9242 = vmatprep.subr.bf16.mxu0 %v9821_v1  ;;  %9260 = vmatprep.subr.bf16.mxu1 %v9821_v1 }
  0xe8   : > { %8622 = vmatmul.mubr.f32.vlgmr.msra.gmra.mrb[2].mxu0 %v1234_v48  ;;  %8664 = vmatmul.mubr.f32.vlgmr.msra.gmra.mrb[2].mxu1 %v1234_v48  ;;  %v4926_v48 = vand.u32 4294901760, %v4925_v47 }
  0xe9   : > { %9244 = vmatpush3.bf16.msk.msra.mxu0 %vm9958_vm4, %v9825_v14  ;;  %9262 = vmatpush3.bf16.msk.msra.mxu1 %vm9972_vm7, %v9825_v14 }
  0xea   : > { %8670 = vmatprep.mubr.msk.f32.mxu0 %vm9822_vm0, %v9823_v4  ;;  %9245 = vmatprep.subr.bf16.mxu0 %v9821_v1  ;;  %v4927_v49 = vsub.f32 %v4925_v47, %v4926_v48 }
  0xeb   : > { %8712 = vmatprep.mubr.msk.f32.mxu1 %vm9822_vm0, %v9823_v4  ;;  %9263 = vmatprep.subr.bf16.mxu1 %v9821_v1 }
  0xec   : > { %8671 = vmatmul.mubr.f32.vlgmr.msra.gmra.mrb[4].mxu0 %v2161_v59  ;;  %8713 = vmatmul.mubr.f32.vlgmr.msra.gmra.mrb[4].mxu1 %v2161_v59  ;;  %v4928_v50 = vand.u32 4294901760, %v4927_v49 }
  0xed   : > { %9247 = vmatpush3.bf16.msra.mxu0 %v9986_v39  ;;  %9265 = vmatpush3.bf16.msra.mxu1 %v9988_v40 }
  0xee   : > { %8677 = vmatprep.mubr.msk.f32.mxu0 %vm9822_vm0, %v9823_v4  ;;  %9248 = vmatprep.subr.bf16.mxu0 %v9821_v1 }
  0xef   : > { %8719 = vmatprep.mubr.msk.f32.mxu1 %vm9822_vm0, %v9823_v4  ;;  %9266 = vmatprep.subr.bf16.mxu1 %v9821_v1 }
  0xf4   : > { %8678 = vmatmul.mubr.f32.vlgmr.msra.gmra.mrb[4].mxu0 %v10105_v55  ;;  %8720 = vmatmul.mubr.f32.vlgmr.msra.gmra.mrb[4].mxu1 %v10105_v55 }
  0xf5   : > { %9250 = vmatpush3.bf16.msra.mxu0 %v9998_v41  ;;  %9268 = vmatpush3.bf16.msra.mxu1 %v10000_v42 }
  0xf6   : > { %8684 = vmatprep.mubr.msk.f32.mxu0 %vm9822_vm0, %v9823_v4  ;;  %9251 = vmatprep.subr.bf16.mxu0 %v9821_v1 }
  0xf7   : > { %8726 = vmatprep.mubr.msk.f32.mxu1 %vm9822_vm0, %v9823_v4  ;;  %9269 = vmatprep.subr.bf16.mxu1 %v9821_v1 }
  0xfc   : > { %8685 = vmatmul.mubr.f32.vlgmr.msra.gmra.mrb[4].mxu0 %v2158_v56  ;;  %8727 = vmatmul.mubr.f32.vlgmr.msra.gmra.mrb[4].mxu1 %v2158_v56 }
  0xfd   : > { %9253 = vmatpush3.bf16.msk.msra.mxu0 %vm9958_vm4, %v9825_v14  ;;  %9271 = vmatpush3.bf16.msk.msra.mxu1 %vm9972_vm7, %v9825_v14 }
  0xfe   : > { %8691 = vmatprep.mubr.msk.f32.mxu0 %vm9822_vm0, %v9823_v4  ;;  %9254 = vmatprep.subr.bf16.mxu0 %v9821_v1 }
  0xff   : > { %8733 = vmatprep.mubr.msk.f32.mxu1 %vm9822_vm0, %v9823_v4  ;;  %9272 = vmatprep.subr.bf16.mxu1 %v9821_v1 }
 0x104   : > { %8692 = vmatmul.mubr.f32.vlgmr.msra.gmra.mrb[4].mxu0 %v2159_v57  ;;  %8734 = vmatmul.mubr.f32.vlgmr.msra.gmra.mrb[4].mxu1 %v2159_v57  ;;  %v6699_v57 = vpop.permute.xlu1 %6698 }
 0x105   : > { %9256 = vmatpush3.bf16.msra.mxu0 %v10024_v43  ;;  %9274 = vmatpush3.bf16.msra.mxu1 %v10026_v44  ;;  %v6700_v58 = vsel %vm241_vm1, %v6699_v57, 0 }
 0x106   : > { %8698 = vmatprep.mubr.msk.f32.mxu0 %vm9822_vm0, %v9823_v4  ;;  %9257 = vmatprep.subr.bf16.mxu0 %v9821_v1  ;;  %v10504_v59 = vand.u32 4294901760, %v6700_v58 }
 0x107   : > { %8740 = vmatprep.mubr.msk.f32.mxu1 %vm9822_vm0, %v9823_v4  ;;  %9275 = vmatprep.subr.bf16.mxu1 %v9821_v1 }
 0x108   : > { %v10512_v60 = vsub.f32 %v6700_v58, %v10504_v59 }
 0x10c   : > { %8699 = vmatmul.mubr.f32.vlgmr.msra.gmra.mrb[4].mxu0 %v10105_v55  ;;  %8741 = vmatmul.mubr.f32.vlgmr.msra.gmra.mrb[4].mxu1 %v10105_v55 }
 0x10d   : > { %9259 = vmatpush3.bf16.msk.msra.mxu0 %vm9958_vm4, %v9825_v14  ;;  %9277 = vmatpush3.bf16.msk.msra.mxu1 %vm9972_vm7, %v9825_v14 }
 0x10e   : > { %8705 = vmatprep.mubr.msk.f32.mxu0 %vm9822_vm0, %v9823_v4  ;;  %8747 = vmatprep.mubr.msk.f32.mxu1 %vm9822_vm0, %v9823_v4 }
 0x10f   : > { %9278 = vmatprep.subr.bf16.mxu0 %v9821_v1  ;;  %9296 = vmatprep.subr.bf16.mxu1 %v9821_v1 }
 0x114   : > { %8706 = vmatmul.mubr.f32.vlgmr.msra.gmra.mrb[4].mxu0 %v10105_v55  ;;  %8748 = vmatmul.mubr.f32.vlgmr.msra.gmra.mrb[4].mxu1 %v10105_v55  ;;  %v5850_v55 = vsub.f32 %v5848_v53, %v5849_v54 }
 0x115   : > { %9280 = vmatpush3.bf16.msk.msra.mxu0 %vm9958_vm4, %v9825_v14  ;;  %9298 = vmatpush3.bf16.msk.msra.mxu1 %vm9972_vm7, %v9825_v14 }
 0x116   : > { %8754 = vmatprep.mubr.msk.f32.mxu0 %vm9822_vm0, %v9823_v4  ;;  %9281 = vmatprep.subr.bf16.mxu0 %v9821_v1  ;;  %v5851_v56 = vand.u32 4294901760, %v5850_v55 }
 0x117   : > { %8796 = vmatprep.mubr.msk.f32.mxu1 %vm9822_vm0, %v9823_v4  ;;  %9299 = vmatprep.subr.bf16.mxu1 %v9821_v1 }
 0x118   : > { %8755 = vmatmul.mubr.f32.vlgmr.msra.gmra.mrb[6].mxu0 %v3083_v3  ;;  %8797 = vmatmul.mubr.f32.vlgmr.msra.gmra.mrb[6].mxu1 %v3083_v3  ;;  %v7703_v3 = vstv %s10498_s21  ;;  %s8174_s21 = sld [smem:[#allocation2 + $0x27]] }
 0x119   : > { %9283 = vmatpush3.bf16.msra.mxu0 %v9986_v39  ;;  %9301 = vmatpush3.bf16.msra.mxu1 %v9988_v40 }
 0x11a   : > { %8761 = vmatprep.mubr.msk.f32.mxu0 %vm9822_vm0, %v9823_v4  ;;  %9284 = vmatprep.subr.bf16.mxu0 %v9821_v1 }
 0x11b   : > { %8803 = vmatprep.mubr.msk.f32.mxu1 %vm9822_vm0, %v9823_v4  ;;  %9302 = vmatprep.subr.bf16.mxu1 %v9821_v1 }
 0x120   : > { %8762 = vmatmul.mubr.f32.vlgmr.msra.gmra.mrb[6].mxu0 %v10173_v62  ;;  %8804 = vmatmul.mubr.f32.vlgmr.msra.gmra.mrb[6].mxu1 %v10173_v62 }
 0x121   : > { %9286 = vmatpush3.bf16.msra.mxu0 %v9998_v41  ;;  %9304 = vmatpush3.bf16.msra.mxu1 %v10000_v42 }
 0x122   : > { %8768 = vmatprep.mubr.msk.f32.mxu0 %vm9822_vm0, %v9823_v4  ;;  %9287 = vmatprep.subr.bf16.mxu0 %v9821_v1 }
 0x123   : > { %8810 = vmatprep.mubr.msk.f32.mxu1 %vm9822_vm0, %v9823_v4  ;;  %9305 = vmatprep.subr.bf16.mxu1 %v9821_v1 }
 0x128   : > { %8769 = vmatmul.mubr.f32.vlgmr.msra.gmra.mrb[6].mxu0 %v3080_v63  ;;  %8811 = vmatmul.mubr.f32.vlgmr.msra.gmra.mrb[6].mxu1 %v3080_v63  ;;  %v7770_v63 = vstv %s8169_s11  ;;  %s8191_s11 = sld [smem:[#allocation2 + $0x36]] }
 0x129   : > { %9289 = vmatpush3.bf16.msk.msra.mxu0 %vm9958_vm4, %v9825_v14  ;;  %9307 = vmatpush3.bf16.msk.msra.mxu1 %vm9972_vm7, %v9825_v14 }
 0x12a   : > { %8775 = vmatprep.mubr.msk.f32.mxu0 %vm9822_vm0, %v9823_v4  ;;  %9290 = vmatprep.subr.bf16.mxu0 %v9821_v1 }
 0x12b   : > { %8817 = vmatprep.mubr.msk.f32.mxu1 %vm9822_vm0, %v9823_v4  ;;  %9308 = vmatprep.subr.bf16.mxu1 %v9821_v1 }
 0x130   : > { %8776 = vmatmul.mubr.f32.vlgmr.msra.gmra.mrb[6].mxu0 %v3081_v0  ;;  %8818 = vmatmul.mubr.f32.vlgmr.msra.gmra.mrb[6].mxu1 %v3081_v0  ;;  %v7841_v0 = vstv %s8187_s18  ;;  %s8140_s18 = sld [smem:[#allocation2 + $0x7]] }
 0x131   : > { %9292 = vmatpush3.bf16.msra.mxu0 %v10024_v43  ;;  %9310 = vmatpush3.bf16.msra.mxu1 %v10026_v44 }
 0x132   : > { %8782 = vmatprep.mubr.msk.f32.mxu0 %vm9822_vm0, %v9823_v4  ;;  %9293 = vmatprep.subr.bf16.mxu0 %v9821_v1 }
 0x133   : > { %8824 = vmatprep.mubr.msk.f32.mxu1 %vm9822_vm0, %v9823_v4  ;;  %9311 = vmatprep.subr.bf16.mxu1 %v9821_v1 }
 0x138   : > { %8783 = vmatmul.mubr.f32.vlgmr.msra.gmra.mrb[6].mxu0 %v10173_v62  ;;  %8825 = vmatmul.mubr.f32.vlgmr.msra.gmra.mrb[6].mxu1 %v10173_v62 }
 0x139   : > { %9295 = vmatpush3.bf16.msk.msra.mxu0 %vm9958_vm4, %v9825_v14  ;;  %9313 = vmatpush3.bf16.msk.msra.mxu1 %vm9972_vm7, %v9825_v14 }
 0x13a   : > { %8789 = vmatprep.mubr.msk.f32.mxu0 %vm9822_vm0, %v9823_v4  ;;  %8831 = vmatprep.mubr.msk.f32.mxu1 %vm9822_vm0, %v9823_v4 }
 0x13b   : > { %9314 = vmatprep.subr.bf16.mxu0 %v9821_v1  ;;  %9332 = vmatprep.subr.bf16.mxu1 %v9821_v1 }
 0x140   : > { %8790 = vmatmul.mubr.f32.vlgmr.msra.gmra.mrb[6].mxu0 %v10173_v62  ;;  %8832 = vmatmul.mubr.f32.vlgmr.msra.gmra.mrb[6].mxu1 %v10173_v62  ;;  %v7699_v62 = vstv %s8151_s10  ;;  %s8173_s10 = sld [smem:[#allocation2 + $0x26]] }
 0x141   : > { %9316 = vmatpush3.bf16.msk.msra.mxu0 %vm9958_vm4, %v9825_v14  ;;  %9334 = vmatpush3.bf16.msk.msra.mxu1 %vm9972_vm7, %v9825_v14 }
 0x142   : > { %8838 = vmatprep.mubr.msk.f32.mxu0 %vm9822_vm0, %v9823_v4  ;;  %9317 = vmatprep.subr.bf16.mxu0 %v9821_v1 }
 0x143   : > { %8880 = vmatprep.mubr.msk.f32.mxu1 %vm9822_vm0, %v9823_v4  ;;  %9335 = vmatprep.subr.bf16.mxu1 %v9821_v1 }
 0x144   : > { %8839 = vmatmul.mubr.f32.vlgmr.msra.gmra.mrb[8].mxu0 %v4006_v11  ;;  %8881 = vmatmul.mubr.f32.vlgmr.msra.gmra.mrb[8].mxu1 %v4006_v11 }
 0x145   : > { %9319 = vmatpush3.bf16.msra.mxu0 %v9986_v39  ;;  %9337 = vmatpush3.bf16.msra.mxu1 %v9988_v40 }
 0x146   : > { %8845 = vmatprep.mubr.msk.f32.mxu0 %vm9822_vm0, %v9823_v4  ;;  %9320 = vmatprep.subr.bf16.mxu0 %v9821_v1 }
 0x147   : > { %8887 = vmatprep.mubr.msk.f32.mxu1 %vm9822_vm0, %v9823_v4  ;;  %9338 = vmatprep.subr.bf16.mxu1 %v9821_v1 }
 0x148   : > { %v700_v22 = vpop.f32.mrb[0].mxu0  ;;  %v1159_v23 = vpop.f32.mrb[0].mxu1 }
 0x149   : > { %v7622_v24 = vmul.f32 %v7621_v12, %v700_v22  ;;  %v7693_v25 = vmul.f32 %v7692_v13, %v700_v22  ;;  %v7764_v26 = vmul.f32 %v7763_v15, %v700_v22  ;;  %v7835_v27 = vmul.f32 %v7834_v16, %v700_v22  ;;  %v8539_v28 = vpop.f32.mrb[1].mxu0  ;;  %v8581_v29 = vpop.f32.mrb[1].mxu1 }
 0x14a   : > { %v7625_v30 = vmul.f32 %v7624_v18, %v1159_v23  ;;  %v7696_v31 = vmul.f32 %v7695_v19, %v1159_v23  ;;  %v7767_v32 = vmul.f32 %v7766_v20, %v1159_v23  ;;  %v7838_v33 = vmul.f32 %v7837_v21, %v1159_v23 }
 0x14c   : > { %8846 = vmatmul.mubr.f32.vlgmr.msra.gmra.mrb[8].mxu0 %v10242_v6  ;;  %8888 = vmatmul.mubr.f32.vlgmr.msra.gmra.mrb[8].mxu1 %v10242_v6  ;;  %v10322_v34 = vadd.f32 %v7625_v30, %v7622_v24  ;;  %v10324_v35 = vadd.f32 %v7696_v31, %v7693_v25  ;;  %v10326_v36 = vadd.f32 %v7767_v32, %v7764_v26 }
 0x14d   : > { %9322 = vmatpush3.bf16.msra.mxu0 %v9998_v41  ;;  %9340 = vmatpush3.bf16.msra.mxu1 %v10000_v42  ;;  %v10330_v37 = vadd.f32 %v7838_v33, %v7835_v27  ;;  %v7640_v33 = vstv %s8138_s4  ;;  %s8158_s4 = sld [smem:[#allocation2 + $0x19]] }
 0x14e   : > { %8852 = vmatprep.mubr.msk.f32.mxu0 %vm9822_vm0, %v9823_v4  ;;  %9323 = vmatprep.subr.bf16.mxu0 %v9821_v1 }
 0x14f   : > { %8894 = vmatprep.mubr.msk.f32.mxu1 %vm9822_vm0, %v9823_v4  ;;  %9341 = vmatprep.subr.bf16.mxu1 %v9821_v1 }
 0x154   : > { %8853 = vmatmul.mubr.f32.vlgmr.msra.gmra.mrb[8].mxu0 %v10253_v7  ;;  %8895 = vmatmul.mubr.f32.vlgmr.msra.gmra.mrb[8].mxu1 %v10253_v7  ;;  %v10522_v7 = vand.u32 4294901760, %v10512_v60 }
 0x155   : > { %9325 = vmatpush3.bf16.msk.msra.mxu0 %vm9958_vm4, %v9825_v14  ;;  %9343 = vmatpush3.bf16.msk.msra.mxu1 %vm9972_vm7, %v9825_v14 }
 0x156   : > { %8859 = vmatprep.mubr.msk.f32.mxu0 %vm9822_vm0, %v9823_v4  ;;  %9326 = vmatprep.subr.bf16.mxu0 %v9821_v1  ;;  %v6772_v31 = vsub.f32 %v10512_v60, %v10522_v7 }
 0x157   : > { %8901 = vmatprep.mubr.msk.f32.mxu1 %vm9822_vm0, %v9823_v4  ;;  %9344 = vmatprep.subr.bf16.mxu1 %v9821_v1 }
 0x158   : > { %v6773_v32 = vand.u32 4294901760, %v6772_v31 }
 0x15c   : > { %8860 = vmatmul.mubr.f32.vlgmr.msra.gmra.mrb[8].mxu0 %v10256_v8  ;;  %8902 = vmatmul.mubr.f32.vlgmr.msra.gmra.mrb[8].mxu1 %v10256_v8 }
 0x15d   : > { %9328 = vmatpush3.bf16.msra.mxu0 %v10024_v43  ;;  %9346 = vmatpush3.bf16.msra.mxu1 %v10026_v44 }
 0x15e   : > { %8866 = vmatprep.mubr.msk.f32.mxu0 %vm9822_vm0, %v9823_v4  ;;  %9329 = vmatprep.subr.bf16.mxu0 %v9821_v1 }
 0x15f   : > { %8908 = vmatprep.mubr.msk.f32.mxu1 %vm9822_vm0, %v9823_v4  ;;  %9347 = vmatprep.subr.bf16.mxu1 %v9821_v1 }
 0x164   : > { %8867 = vmatmul.mubr.f32.vlgmr.msra.gmra.mrb[8].mxu0 %v10242_v6  ;;  %8909 = vmatmul.mubr.f32.vlgmr.msra.gmra.mrb[8].mxu1 %v10242_v6 }
 0x165   : > { %9331 = vmatpush3.bf16.msk.msra.mxu0 %vm9958_vm4, %v9825_v14  ;;  %9349 = vmatpush3.bf16.msk.msra.mxu1 %vm9972_vm7, %v9825_v14 }
 0x166   : > { %8873 = vmatprep.mubr.msk.f32.mxu0 %vm9822_vm0, %v9823_v4  ;;  %8915 = vmatprep.mubr.msk.f32.mxu1 %vm9822_vm0, %v9823_v4 }
 0x167   : > { %9350 = vmatprep.subr.bf16.mxu0 %v9821_v1  ;;  %9368 = vmatprep.subr.bf16.mxu1 %v9821_v1 }
 0x16c   : > { %8874 = vmatmul.mubr.f32.vlgmr.msra.gmra.mrb[8].mxu0 %v10242_v6  ;;  %8916 = vmatmul.mubr.f32.vlgmr.msra.gmra.mrb[8].mxu1 %v10242_v6  ;;  %v7845_v6 = vstv %s10502_s26  ;;  %s8141_s26 = sld [smem:[#allocation2 + $0x8]] }
 0x16d   : > { %9352 = vmatpush3.bf16.msk.msra.mxu0 %vm9958_vm4, %v9825_v14  ;;  %9370 = vmatpush3.bf16.msk.msra.mxu1 %vm9972_vm7, %v9825_v14 }
 0x16e   : > { %8922 = vmatprep.mubr.msk.f32.mxu0 %vm9822_vm0, %v9823_v4  ;;  %9353 = vmatprep.subr.bf16.mxu0 %v9821_v1 }
 0x16f   : > { %8964 = vmatprep.mubr.msk.f32.mxu1 %vm9822_vm0, %v9823_v4  ;;  %9371 = vmatprep.subr.bf16.mxu1 %v9821_v1 }
 0x170   : > { %8923 = vmatmul.mubr.f32.vlgmr.msra.gmra.mrb[10].mxu0 %v4928_v50  ;;  %8965 = vmatmul.mubr.f32.vlgmr.msra.gmra.mrb[10].mxu1 %v4928_v50 }
 0x171   : > { %9355 = vmatpush3.bf16.msra.mxu0 %v9986_v39  ;;  %9373 = vmatpush3.bf16.msra.mxu1 %v9988_v40 }
 0x172   : > { %8929 = vmatprep.mubr.msk.f32.mxu0 %vm9822_vm0, %v9823_v4  ;;  %9356 = vmatprep.subr.bf16.mxu0 %v9821_v1 }
 0x173   : > { %8971 = vmatprep.mubr.msk.f32.mxu1 %vm9822_vm0, %v9823_v4  ;;  %9374 = vmatprep.subr.bf16.mxu1 %v9821_v1 }
 0x178   : > { %8930 = vmatmul.mubr.f32.vlgmr.msra.gmra.mrb[10].mxu0 %v10357_v46  ;;  %8972 = vmatmul.mubr.f32.vlgmr.msra.gmra.mrb[10].mxu1 %v10357_v46 }
 0x179   : > { %9358 = vmatpush3.bf16.msra.mxu0 %v9998_v41  ;;  %9376 = vmatpush3.bf16.msra.mxu1 %v10000_v42 }
 0x17a   : > { %8936 = vmatprep.mubr.msk.f32.mxu0 %vm9822_vm0, %v9823_v4  ;;  %9359 = vmatprep.subr.bf16.mxu0 %v9821_v1 }
 0x17b   : > { %8978 = vmatprep.mubr.msk.f32.mxu1 %vm9822_vm0, %v9823_v4  ;;  %9377 = vmatprep.subr.bf16.mxu1 %v9821_v1 }
 0x180   : > { %8937 = vmatmul.mubr.f32.vlgmr.msra.gmra.mrb[10].mxu0 %v4925_v47  ;;  %8979 = vmatmul.mubr.f32.vlgmr.msra.gmra.mrb[10].mxu1 %v4925_v47 }
 0x181   : > { %9361 = vmatpush3.bf16.msk.msra.mxu0 %vm9958_vm4, %v9825_v14  ;;  %9379 = vmatpush3.bf16.msk.msra.mxu1 %vm9972_vm7, %v9825_v14 }
 0x182   : > { %8943 = vmatprep.mubr.msk.f32.mxu0 %vm9822_vm0, %v9823_v4  ;;  %9362 = vmatprep.subr.bf16.mxu0 %v9821_v1 }
 0x183   : > { %8985 = vmatprep.mubr.msk.f32.mxu1 %vm9822_vm0, %v9823_v4  ;;  %9380 = vmatprep.subr.bf16.mxu1 %v9821_v1 }
 0x188   : > { %8944 = vmatmul.mubr.f32.vlgmr.msra.gmra.mrb[10].mxu0 %v4926_v48  ;;  %8986 = vmatmul.mubr.f32.vlgmr.msra.gmra.mrb[10].mxu1 %v4926_v48 }
 0x189   : > { %9364 = vmatpush3.bf16.msra.mxu0 %v10024_v43  ;;  %9382 = vmatpush3.bf16.msra.mxu1 %v10026_v44 }
 0x18a   : > { %8950 = vmatprep.mubr.msk.f32.mxu0 %vm9822_vm0, %v9823_v4  ;;  %9365 = vmatprep.subr.bf16.mxu0 %v9821_v1 }
 0x18b   : > { %8992 = vmatprep.mubr.msk.f32.mxu1 %vm9822_vm0, %v9823_v4  ;;  %9383 = vmatprep.subr.bf16.mxu1 %v9821_v1 }
 0x190   : > { %8951 = vmatmul.mubr.f32.vlgmr.msra.gmra.mrb[10].mxu0 %v10357_v46  ;;  %8993 = vmatmul.mubr.f32.vlgmr.msra.gmra.mrb[10].mxu1 %v10357_v46 }
 0x191   : > { %9367 = vmatpush3.bf16.msk.msra.mxu0 %vm9958_vm4, %v9825_v14  ;;  %9385 = vmatpush3.bf16.msk.msra.mxu1 %vm9972_vm7, %v9825_v14 }
 0x192   : > { %8957 = vmatprep.mubr.msk.f32.mxu0 %vm9822_vm0, %v9823_v4  ;;  %8999 = vmatprep.mubr.msk.f32.mxu1 %vm9822_vm0, %v9823_v4 }
 0x193   : > { %9386 = vmatprep.subr.bf16.mxu0 %v9821_v1  ;;  %9404 = vmatprep.subr.bf16.mxu1 %v9821_v1 }
 0x198   : > { %8958 = vmatmul.mubr.f32.vlgmr.msra.gmra.mrb[10].mxu0 %v10357_v46  ;;  %9000 = vmatmul.mubr.f32.vlgmr.msra.gmra.mrb[10].mxu1 %v10357_v46 }
 0x199   : > { %9388 = vmatpush3.bf16.msk.msra.mxu0 %vm9958_vm4, %v9825_v14  ;;  %9406 = vmatpush3.bf16.msk.msra.mxu1 %vm9972_vm7, %v9825_v14 }
 0x19a   : > { %9006 = vmatprep.mubr.msk.f32.mxu0 %vm9822_vm0, %v9823_v4  ;;  %9389 = vmatprep.subr.bf16.mxu0 %v9821_v1 }
 0x19b   : > { %9048 = vmatprep.mubr.msk.f32.mxu1 %vm9822_vm0, %v9823_v4  ;;  %9407 = vmatprep.subr.bf16.mxu1 %v9821_v1 }
 0x19c   : > { %9007 = vmatmul.mubr.f32.vlgmr.msra.gmra.mrb[12].mxu0 %v5851_v56  ;;  %9049 = vmatmul.mubr.f32.vlgmr.msra.gmra.mrb[12].mxu1 %v5851_v56 }
 0x19d   : > { %9391 = vmatpush3.bf16.msra.mxu0 %v9986_v39  ;;  %9409 = vmatpush3.bf16.msra.mxu1 %v9988_v40 }
 0x19e   : > { %9013 = vmatprep.mubr.msk.f32.mxu0 %vm9822_vm0, %v9823_v4  ;;  %9392 = vmatprep.subr.bf16.mxu0 %v9821_v1 }
 0x19f   : > { %9055 = vmatprep.mubr.msk.f32.mxu1 %vm9822_vm0, %v9823_v4  ;;  %9410 = vmatprep.subr.bf16.mxu1 %v9821_v1 }
 0x1a4   : > { %9014 = vmatmul.mubr.f32.vlgmr.msra.gmra.mrb[12].mxu0 %v10426_v52  ;;  %9056 = vmatmul.mubr.f32.vlgmr.msra.gmra.mrb[12].mxu1 %v10426_v52 }
 0x1a5   : > { %9394 = vmatpush3.bf16.msra.mxu0 %v9998_v41  ;;  %9412 = vmatpush3.bf16.msra.mxu1 %v10000_v42 }
 0x1a6   : > { %9020 = vmatprep.mubr.msk.f32.mxu0 %vm9822_vm0, %v9823_v4  ;;  %9395 = vmatprep.subr.bf16.mxu0 %v9821_v1 }
 0x1a7   : > { %9062 = vmatprep.mubr.msk.f32.mxu1 %vm9822_vm0, %v9823_v4  ;;  %9413 = vmatprep.subr.bf16.mxu1 %v9821_v1 }
 0x1ac   : > { %9021 = vmatmul.mubr.f32.vlgmr.msra.gmra.mrb[12].mxu0 %v5848_v53  ;;  %9063 = vmatmul.mubr.f32.vlgmr.msra.gmra.mrb[12].mxu1 %v5848_v53 }
 0x1ad   : > { %9397 = vmatpush3.bf16.msk.msra.mxu0 %vm9958_vm4, %v9825_v14  ;;  %9415 = vmatpush3.bf16.msk.msra.mxu1 %vm9972_vm7, %v9825_v14 }
 0x1ae   : > { %9027 = vmatprep.mubr.msk.f32.mxu0 %vm9822_vm0, %v9823_v4  ;;  %9398 = vmatprep.subr.bf16.mxu0 %v9821_v1 }
 0x1af   : > { %9069 = vmatprep.mubr.msk.f32.mxu1 %vm9822_vm0, %v9823_v4  ;;  %9416 = vmatprep.subr.bf16.mxu1 %v9821_v1 }
 0x1b4   : > { %9028 = vmatmul.mubr.f32.vlgmr.msra.gmra.mrb[12].mxu0 %v5849_v54  ;;  %9070 = vmatmul.mubr.f32.vlgmr.msra.gmra.mrb[12].mxu1 %v5849_v54 }
 0x1b5   : > { %9400 = vmatpush3.bf16.msra.mxu0 %v10024_v43  ;;  %9418 = vmatpush3.bf16.msra.mxu1 %v10026_v44 }
 0x1b6   : > { %9034 = vmatprep.mubr.msk.f32.mxu0 %vm9822_vm0, %v9823_v4  ;;  %9401 = vmatprep.subr.bf16.mxu0 %v9821_v1 }
 0x1b7   : > { %9076 = vmatprep.mubr.msk.f32.mxu1 %vm9822_vm0, %v9823_v4  ;;  %9419 = vmatprep.subr.bf16.mxu1 %v9821_v1 }
 0x1bb   : > { %v1622_v8 = vpop.f32.mrb[2].mxu0  ;;  %v2081_v9 = vpop.f32.mrb[2].mxu1 }
 0x1bc   : > { %v7629_v11 = vmul.f32 %v7628_v61, %v1622_v8  ;;  %v7700_v12 = vmul.f32 %v7699_v62, %v1622_v8  ;;  %v7771_v13 = vmul.f32 %v7770_v63, %v1622_v8  ;;  %v7842_v15 = vmul.f32 %v7841_v0, %v1622_v8  ;;  %v8623_v16 = vpop.f32.mrb[3].mxu0  ;;  %v8665_v18 = vpop.f32.mrb[3].mxu1  ;;  %9035 = vmatmul.mubr.f32.vlgmr.msra.gmra.mrb[12].mxu0 %v10426_v52 }
 0x1bd   : > { %v7633_v19 = vmul.f32 %v7632_v2, %v2081_v9  ;;  %v7704_v20 = vmul.f32 %v7703_v3, %v2081_v9  ;;  %v7775_v21 = vmul.f32 %v7774_v5, %v2081_v9  ;;  %v7846_v22 = vmul.f32 %v7845_v6, %v2081_v9  ;;  %9403 = vmatpush3.bf16.msk.msra.mxu0 %vm9958_vm4, %v9825_v14 }
 0x1be   : > { %v7630_v23 = vadd.f32 %v7629_v11, %v10322_v34  ;;  %v7701_v24 = vadd.f32 %v7700_v12, %v10324_v35  ;;  %v7772_v25 = vadd.f32 %v7771_v13, %v10326_v36  ;;  %v7843_v26 = vadd.f32 %v7842_v15, %v10330_v37  ;;  %9077 = vmatmul.mubr.f32.vlgmr.msra.gmra.mrb[12].mxu1 %v10426_v52 }
 0x1bf   : > { %9421 = vmatpush3.bf16.msk.msra.mxu1 %vm9972_vm7, %v9825_v14  ;;  %9041 = vmatprep.mubr.msk.f32.mxu0 %vm9822_vm0, %v9823_v4  ;;  %v7782_v34 = vstv %s8172_s6  ;;  %v7853_v35 = vstv %s8190_s7  ;;  %v7857_v61 = vstv %s8191_s11  ;;  %v7648_v62 = vstv %s8140_s18  ;;  %s8194_s6 = sld [smem:[#allocation2 + $0x39]]  ;;  %s8143_s7 = sld [smem:[#allocation2 + $0xa]] }
 0x1c0   : > { %v10538_v27 = vadd.f32 %v7633_v19, %v7630_v23  ;;  %v10540_v28 = vadd.f32 %v7704_v20, %v7701_v24  ;;  %v10542_v29 = vadd.f32 %v7775_v21, %v7772_v25  ;;  %v10544_v30 = vadd.f32 %v7846_v22, %v7843_v26  ;;  %9083 = vmatprep.mubr.msk.f32.mxu1 %vm9822_vm0, %v9823_v4  ;;  %s8144_s11 = sld [smem:[#allocation2 + $0xb]] }
 0x1c1   : > { %9422 = vmatprep.subr.bf16.mxu0 %v9821_v1  ;;  %9440 = vmatprep.subr.bf16.mxu1 %v9821_v1  ;;  %v7719_v63 = vstv %s8156_s19  ;;  %v7790_v0 = vstv %s8174_s21  ;;  %v7652_v25 = vstv %s8141_s26  ;;  %s8160_s18 = sld [smem:[#allocation2 + $0x1b]]  ;;  %s8161_s26 = sld [smem:[#allocation2 + $0x1c]] }
 0x1c2   : > { %s8178_s19 = sld [smem:[#allocation2 + $0x2b]] }
 0x1c3   : > { %s8196_s21 = sld [smem:[#allocation2 + $0x3b]] }
 0x1c4   : > { %9042 = vmatmul.mubr.f32.vlgmr.msra.gmra.mrb[12].mxu0 %v10426_v52 }
 0x1c5   : > { %9424 = vmatpush3.bf16.msk.msra.mxu0 %vm9958_vm4, %v9825_v14  ;;  %9090 = vmatprep.mubr.msk.f32.mxu0 %vm9822_vm0, %v9823_v4 }
 0x1c6   : > { %9084 = vmatmul.mubr.f32.vlgmr.msra.gmra.mrb[12].mxu1 %v10426_v52  ;;  %9425 = vmatprep.subr.bf16.mxu0 %v9821_v1 }
 0x1c7   : > { %9442 = vmatpush3.bf16.msk.msra.mxu1 %vm9972_vm7, %v9825_v14  ;;  %9132 = vmatprep.mubr.msk.f32.mxu1 %vm9822_vm0, %v9823_v4 }
 0x1c8   : > { %9091 = vmatmul.mubr.f32.vlgmr.msra.gmra.mrb[14].mxu0 %v6773_v32  ;;  %9443 = vmatprep.subr.bf16.mxu1 %v9821_v1 }
 0x1c9   : > { %9427 = vmatpush3.bf16.msra.mxu0 %v9986_v39  ;;  %9097 = vmatprep.mubr.msk.f32.mxu0 %vm9822_vm0, %v9823_v4  ;;  %v7636_v39 = vstv %s8137_s27  ;;  %s8157_s27 = sld [smem:[#allocation2 + $0x18]] }
 0x1ca   : > { %9133 = vmatmul.mubr.f32.vlgmr.msra.gmra.mrb[14].mxu1 %v6773_v32  ;;  %9428 = vmatprep.subr.bf16.mxu0 %v9821_v1  ;;  %v7869_v32 = vstv %s8194_s6  ;;  %s8147_s6 = sld [smem:[#allocation2 + $0xe]] }
 0x1cb   : > { %9445 = vmatpush3.bf16.msra.mxu1 %v9988_v40  ;;  %9139 = vmatprep.mubr.msk.f32.mxu1 %vm9822_vm0, %v9823_v4  ;;  %v7707_v40 = vstv %s8153_s28  ;;  %s8175_s28 = sld [smem:[#allocation2 + $0x28]] }
 0x1cc   : > { %9446 = vmatprep.subr.bf16.mxu1 %v9821_v1 }
 0x1cf   : > { %v7723_v26 = vstv %s8157_s27  ;;  %s8179_s27 = sld [smem:[#allocation2 + $0x2c]] }
 0x1d0   : > { %9098 = vmatmul.mubr.f32.vlgmr.msra.gmra.mrb[14].mxu0 %v10504_v59 }
 0x1d1   : > { %9430 = vmatpush3.bf16.msra.mxu0 %v9998_v41  ;;  %9104 = vmatprep.mubr.msk.f32.mxu0 %vm9822_vm0, %v9823_v4  ;;  %v7778_v41 = vstv %s8171_s29  ;;  %s8193_s29 = sld [smem:[#allocation2 + $0x38]] }
 0x1d2   : > { %9140 = vmatmul.mubr.f32.vlgmr.msra.gmra.mrb[14].mxu1 %v10504_v59  ;;  %9431 = vmatprep.subr.bf16.mxu0 %v9821_v1 }
 0x1d3   : > { %9448 = vmatpush3.bf16.msra.mxu1 %v10000_v42  ;;  %9146 = vmatprep.mubr.msk.f32.mxu1 %vm9822_vm0, %v9823_v4  ;;  %v7849_v42 = vstv %s8189_s30  ;;  %s8142_s30 = sld [smem:[#allocation2 + $0x9]] }
 0x1d4   : > { %9449 = vmatprep.subr.bf16.mxu1 %v9821_v1 }
 0x1d8   : > { %9105 = vmatmul.mubr.f32.vlgmr.msra.gmra.mrb[14].mxu0 %v10512_v60 }
 0x1d9   : > { %9433 = vmatpush3.bf16.msk.msra.mxu0 %vm9958_vm4, %v9825_v14  ;;  %9111 = vmatprep.mubr.msk.f32.mxu0 %vm9822_vm0, %v9823_v4 }
 0x1da   : > { %9147 = vmatmul.mubr.f32.vlgmr.msra.gmra.mrb[14].mxu1 %v10512_v60  ;;  %9434 = vmatprep.subr.bf16.mxu0 %v9821_v1  ;;  %v7786_v60 = vstv %s8173_s10  ;;  %s8195_s10 = sld [smem:[#allocation2 + $0x3a]] }
 0x1db   : > { %9451 = vmatpush3.bf16.msk.msra.mxu1 %vm9972_vm7, %v9825_v14  ;;  %9153 = vmatprep.mubr.msk.f32.mxu1 %vm9822_vm0, %v9823_v4 }
 0x1dc   : > { %9452 = vmatprep.subr.bf16.mxu1 %v9821_v1 }
 0x1e0   : > { %9112 = vmatmul.mubr.f32.vlgmr.msra.gmra.mrb[14].mxu0 %v10522_v7 }
 0x1e1   : > { %9436 = vmatpush3.bf16.msra.mxu0 %v10024_v43  ;;  %9118 = vmatprep.mubr.msk.f32.mxu0 %vm9822_vm0, %v9823_v4  ;;  %v7711_v43 = vstv %s8154_s5  ;;  %s8176_s5 = sld [smem:[#allocation2 + $0x29]] }
 0x1e2   : > { %9154 = vmatmul.mubr.f32.vlgmr.msra.gmra.mrb[14].mxu1 %v10522_v7  ;;  %9437 = vmatprep.subr.bf16.mxu0 %v9821_v1 }
 0x1e3   : > { %9454 = vmatpush3.bf16.msra.mxu1 %v10026_v44  ;;  %9160 = vmatprep.mubr.msk.f32.mxu1 %vm9822_vm0, %v9823_v4 }
 0x1e4   : > { %9455 = vmatprep.subr.bf16.mxu1 %v9821_v1 }
 0x1e7   : > { %v2545_v36 = vpop.f32.mrb[4].mxu0  ;;  %v3004_v37 = vpop.f32.mrb[4].mxu1  ;;  %v7798_v31 = vstv %s8176_s5  ;;  %s8198_s5 = sld [smem:[#allocation2 + $0x3d]] }
 0x1e8   : > { %v7637_v38 = vmul.f32 %v7636_v39, %v2545_v36  ;;  %v7708_v45 = vmul.f32 %v7707_v40, %v2545_v36  ;;  %v7779_v46 = vmul.f32 %v7778_v41, %v2545_v36  ;;  %v7850_v47 = vmul.f32 %v7849_v42, %v2545_v36  ;;  %v8707_v44 = vpop.f32.mrb[5].mxu0  ;;  %v8749_v48 = vpop.f32.mrb[5].mxu1  ;;  %9119 = vmatmul.mubr.f32.vlgmr.msra.gmra.mrb[14].mxu0 %v10504_v59 }
 0x1e9   : > { %v7641_v49 = vmul.f32 %v7640_v33, %v3004_v37  ;;  %v7712_v1 = vmul.f32 %v7711_v43, %v3004_v37  ;;  %v7783_v50 = vmul.f32 %v7782_v34, %v3004_v37  ;;  %v7854_v51 = vmul.f32 %v7853_v35, %v3004_v37  ;;  %9439 = vmatpush3.bf16.msk.msra.mxu0 %vm9958_vm4, %v9825_v14 }
 0x1ea   : > { %v7638_v52 = vadd.f32 %v7637_v38, %v10538_v27  ;;  %v7709_v53 = vadd.f32 %v7708_v45, %v10540_v28  ;;  %v7780_v54 = vadd.f32 %v7779_v46, %v10542_v29  ;;  %v7851_v55 = vadd.f32 %v7850_v47, %v10544_v30  ;;  %9161 = vmatmul.mubr.f32.vlgmr.msra.gmra.mrb[14].mxu1 %v10504_v59 }
 0x1eb   : > { %9457 = vmatpush3.bf16.msk.msra.mxu1 %vm9972_vm7, %v9825_v14  ;;  %9125 = vmatprep.mubr.msk.f32.mxu0 %vm9822_vm0, %v9823_v4  ;;  %v7644_v14 = vstv %s8139_s8  ;;  %v7794_v27 = vstv %s8175_s28  ;;  %v7865_v28 = vstv %s8193_s29  ;;  %v7656_v29 = vstv %s8142_s30  ;;  %s8159_s8 = sld [smem:[#allocation2 + $0x1a]]  ;;  %s8197_s28 = sld [smem:[#allocation2 + $0x3c]] }
 0x1ec   : > { %v7642_v56 = vadd.f32 %v7641_v49, %v7638_v52  ;;  %v7713_v10 = vadd.f32 %v7712_v1, %v7709_v53  ;;  %v7784_v57 = vadd.f32 %v7783_v50, %v7780_v54  ;;  %v7855_v58 = vadd.f32 %v7854_v51, %v7851_v55  ;;  %9167 = vmatprep.mubr.msk.f32.mxu1 %vm9822_vm0, %v9823_v4  ;;  %s8146_s29 = sld [smem:[#allocation2 + $0xd]] }
 0x1ed   : > { %v7861_v4 = vstv %s8192_s23  ;;  %v7727_v30 = vstv %s8158_s4  ;;  %v7660_v52 = vstv %s8143_s7  ;;  %v7802_v54 = vstv %s8177_s9  ;;  %s8145_s23 = sld [smem:[#allocation2 + $0xc]]  ;;  %s8162_s30 = sld [smem:[#allocation2 + $0x1d]] }
 0x1ee   : > { %v7873_v55 = vstv %s8195_s10  ;;  %s8180_s4 = sld [smem:[#allocation2 + $0x2d]]  ;;  %s8163_s7 = sld [smem:[#allocation2 + $0x1e]] }
 0x1ef   : > { %s8199_s9 = sld [smem:[#allocation2 + $0x3e]]  ;;  %s8148_s10 = sld [smem:[#allocation2 + $0xf]] }
 0x1f0   : > { %9126 = vmatmul.mubr.f32.vlgmr.msra.gmra.mrb[14].mxu0 %v10504_v59 }
 0x1f1   : > { %v7731_v53 = vstv %s8159_s8  ;;  %s8181_s8 = sld [smem:[#allocation2 + $0x2e]] }
 0x1f2   : > { %9168 = vmatmul.mubr.f32.vlgmr.msra.gmra.mrb[14].mxu1 %v10504_v59 }
 0x213   : > { %v3467_v2 = vpop.f32.mrb[6].mxu0  ;;  %v3926_v3 = vpop.f32.mrb[6].mxu1 }
 0x214   : > { %v7645_v5 = vmul.f32 %v7644_v14, %v3467_v2  ;;  %v7716_v59 = vmul.f32 %v7715_v17, %v3467_v2  ;;  %v7787_v6 = vmul.f32 %v7786_v60, %v3467_v2  ;;  %v7858_v7 = vmul.f32 %v7857_v61, %v3467_v2  ;;  %v8791_v8 = vpop.f32.mrb[7].mxu0  ;;  %v8833_v9 = vpop.f32.mrb[7].mxu1 }
 0x215   : > { %v7649_v11 = vmul.f32 %v7648_v62, %v3926_v3  ;;  %v7720_v12 = vmul.f32 %v7719_v63, %v3926_v3  ;;  %v7791_v13 = vmul.f32 %v7790_v0, %v3926_v3  ;;  %v7862_v15 = vmul.f32 %v7861_v4, %v3926_v3 }
 0x216   : > { %v7646_v16 = vadd.f32 %v7645_v5, %v7642_v56  ;;  %v7717_v18 = vadd.f32 %v7716_v59, %v7713_v10  ;;  %v7788_v19 = vadd.f32 %v7787_v6, %v7784_v57  ;;  %v7859_v20 = vadd.f32 %v7858_v7, %v7855_v58 }
 0x217   : > { %v7664_v56 = vstv %s8144_s11  ;;  %v7735_v10 = vstv %s8160_s18  ;;  %v7806_v57 = vstv %s8178_s19  ;;  %v7877_v58 = vstv %s8196_s21  ;;  %s8164_s11 = sld [smem:[#allocation2 + $0x1f]]  ;;  %s10626_s21 = sld [smem:[#allocation5]] }
 0x218   : > { %v7650_v21 = vadd.f32 %v7649_v11, %v7646_v16  ;;  %v7721_v22 = vadd.f32 %v7720_v12, %v7717_v18  ;;  %v7792_v23 = vadd.f32 %v7791_v13, %v7788_v19  ;;  %v7863_v24 = vadd.f32 %v7862_v15, %v7859_v20  ;;  %s8182_s18 = sld [smem:[#allocation2 + $0x2f]] }
 0x219   : > { %v7668_v16 = vstv %s8145_s23  ;;  %v7739_v18 = vstv %s8161_s26  ;;  %v7810_v19 = vstv %s8179_s27  ;;  %v7881_v20 = vstv %s8197_s28  ;;  %s8200_s19 = sld [smem:[#allocation2 + $0x3f]]  ;;  %s10628_s23 = sld [smem:[#allocation5 + $0x1]] }
 0x21a   : > { %s10630_s26 = sld [smem:[#allocation5 + $0x2]]  ;;  %s10632_s27 = sld [smem:[#allocation5 + $0x3]] }
 0x21b   : > { %s210_s28 = sand.u32 1, %s9801_s13  }
 0x23f   : > { %v4390_v39 = vpop.f32.mrb[8].mxu0  ;;  %v4849_v40 = vpop.f32.mrb[8].mxu1 }
 0x240   : > { %v7653_v41 = vmul.f32 %v7652_v25, %v4390_v39  ;;  %v7724_v42 = vmul.f32 %v7723_v26, %v4390_v39  ;;  %v7795_v33 = vmul.f32 %v7794_v27, %v4390_v39  ;;  %v7866_v43 = vmul.f32 %v7865_v28, %v4390_v39  ;;  %v8875_v34 = vpop.f32.mrb[9].mxu0  ;;  %v8917_v35 = vpop.f32.mrb[9].mxu1 }
 0x241   : > { %v7657_v36 = vmul.f32 %v7656_v29, %v4849_v40  ;;  %v7728_v37 = vmul.f32 %v7727_v30, %v4849_v40  ;;  %v7799_v38 = vmul.f32 %v7798_v31, %v4849_v40  ;;  %v7870_v45 = vmul.f32 %v7869_v32, %v4849_v40 }
 0x242   : > { %v7654_v46 = vadd.f32 %v7653_v41, %v7650_v21  ;;  %v7725_v47 = vadd.f32 %v7724_v42, %v7721_v22  ;;  %v7796_v44 = vadd.f32 %v7795_v33, %v7792_v23  ;;  %v7867_v48 = vadd.f32 %v7866_v43, %v7863_v24 }
 0x243   : > { %v7672_v22 = vstv %s8146_s29  ;;  %v7743_v23 = vstv %s8162_s30  ;;  %v7814_v24 = vstv %s8180_s4  ;;  %v7885_v25 = vstv %s8198_s5  ;;  %s8028_s29 = sshll.u32 %s210_s28, 5  ;;  %s8209_s30 = sshll.u32 %s9809_s15, 9 }
 0x244   : > { %v7658_v49 = vadd.f32 %v7657_v36, %v7654_v46  ;;  %v7729_v1 = vadd.f32 %v7728_v37, %v7725_v47  ;;  %v7800_v50 = vadd.f32 %v7799_v38, %v7796_v44  ;;  %v7871_v51 = vadd.f32 %v7870_v45, %v7867_v48  ;;  %s212_s4 = scalar_lea.vmem [#allocation7], %s8028_s29  ;;  %s10655_s15 = scalar_lea.sflag [#allocation3], %s210_s28 }
 0x245   : > { %v7676_v46 = vstv %s8147_s6  ;;  %v7747_v47 = vstv %s8163_s7  ;;  %v7818_v44 = vstv %s8181_s8  ;;  %v7889_v48 = vstv %s8199_s9  ;;  %s7919_s5 = sshll.u32 %s212_s4, 4  ;;  %s10645_s8 = scalar_lea.hbm %s10704_s3, %s8209_s30  ;;  %s10647_s5 = int_to_ptr.vmem [resolvable:$true] %s7919_s5 }
 0x246   : > { %s9731_s9 = scalar_lea.vmem %s10647_s5, 512 }
 0x247   : > { %p9732_p8 = scmp.ne.s32.totalorder %s10647_s5, %s9731_s9 }
 0x249   : > { %p9733_p11 = pnand %p9732_p8, %p10720_p10 }
 0x24b   : > { %p9734_p13 = pneg %p9733_p11 }
 0x26b   : > { %v5312_v14 = vpop.f32.mrb[10].mxu0  ;;  %v5771_v17 = vpop.f32.mrb[10].mxu1 }
 0x26c   : > { %v7661_v60 = vmul.f32 %v7660_v52, %v5312_v14  ;;  %v7732_v61 = vmul.f32 %v7731_v53, %v5312_v14  ;;  %v7803_v62 = vmul.f32 %v7802_v54, %v5312_v14  ;;  %v7874_v63 = vmul.f32 %v7873_v55, %v5312_v14  ;;  %v8959_v0 = vpop.f32.mrb[11].mxu0  ;;  %v9001_v4 = vpop.f32.mrb[11].mxu1 }
 0x26d   : > { %v7665_v2 = vmul.f32 %v7664_v56, %v5771_v17  ;;  %v7736_v3 = vmul.f32 %v7735_v10, %v5771_v17  ;;  %v7807_v5 = vmul.f32 %v7806_v57, %v5771_v17  ;;  %v7878_v59 = vmul.f32 %v7877_v58, %v5771_v17 }
 0x26e   : > { %v7662_v6 = vadd.f32 %v7661_v60, %v7658_v49  ;;  %v7733_v7 = vadd.f32 %v7732_v61, %v7729_v1  ;;  %v7804_v8 = vadd.f32 %v7803_v62, %v7800_v50  ;;  %v7875_v9 = vadd.f32 %v7874_v63, %v7871_v51 }
 0x26f   : > { %v7680_v1 = vstv %s8148_s10  ;;  %v7751_v50 = vstv %s8164_s11  ;;  %v7822_v51 = vstv %s8182_s18  ;;  %v7893_v52 = vstv %s8200_s19  ;;  %s9826_s10 = smov [#allocation7]  }
 0x270   : > { %v7666_v11 = vadd.f32 %v7665_v2, %v7662_v6  ;;  %v7737_v12 = vadd.f32 %v7736_v3, %v7733_v7  ;;  %v7808_v13 = vadd.f32 %v7807_v5, %v7804_v8  ;;  %v7879_v15 = vadd.f32 %v7878_v59, %v7875_v9  ;;  %s9735_s11 = sshll.u32 %s9826_s10, 4  ;;  %s9736_s11 = int_to_ptr.vmem [resolvable:$false] %s9735_s11 }
 0x271   : > { %v7684_v2 = vstv %s10626_s21  ;;  %v7755_v3 = vstv %s10628_s23  ;;  %v7826_v5 = vstv %s10630_s26  ;;  %v7897_v59 = vstv %s10632_s27  ;;  %s9737_s18 = scalar_lea.vmem %s9736_s11, 1024  ;;  %p9738_p1 = scmp.lt.s32.totalorder %s10647_s5, %s9736_s11 }
 0x272   : > { %p9739_p6 = scmp.lt.s32.totalorder %s9737_s18, %s9731_s9 }
 0x274   : > { %p9740_p7 = por %p9739_p6, %p9738_p1 }
 0x276   : > { %p9741_p9 = pnand %p9740_p7, %p9734_p13 }
 0x297   : > { %v6235_v21 = vpop.f32.mrb[12].mxu0 }
 0x298   : > { %v7669_v26 = vmul.f32 %v7668_v16, %v6235_v21  ;;  %v7740_v27 = vmul.f32 %v7739_v18, %v6235_v21  ;;  %v7811_v28 = vmul.f32 %v7810_v19, %v6235_v21  ;;  %v7882_v29 = vmul.f32 %v7881_v20, %v6235_v21  ;;  %v9043_v30 = vpop.f32.mrb[13].mxu0 }
 0x299   : > { %v6694_v31 = vpop.f32.mrb[12].mxu1 }
 0x29a   : > { %v7670_v32 = vadd.f32 %v7669_v26, %v7666_v11  ;;  %v7741_v39 = vadd.f32 %v7740_v27, %v7737_v12  ;;  %v7812_v40 = vadd.f32 %v7811_v28, %v7808_v13  ;;  %v7883_v41 = vadd.f32 %v7882_v29, %v7879_v15  ;;  %v9085_v42 = vpop.f32.mrb[13].mxu1 }
 0x29b   : > { %v7673_v33 = vmul.f32 %v7672_v22, %v6694_v31  ;;  %v7744_v43 = vmul.f32 %v7743_v23, %v6694_v31  ;;  %v7815_v34 = vmul.f32 %v7814_v24, %v6694_v31  ;;  %v7886_v35 = vmul.f32 %v7885_v25, %v6694_v31 }
 0x29d   : > { %v7674_v36 = vadd.f32 %v7673_v33, %v7670_v32  ;;  %v7745_v37 = vadd.f32 %v7744_v43, %v7741_v39  ;;  %v7816_v38 = vadd.f32 %v7815_v34, %v7812_v40  ;;  %v7887_v45 = vadd.f32 %v7886_v35, %v7883_v41 }
 0x2c3   : > { %v7157_v49 = vpop.f32.mrb[14].mxu0 }
 0x2c4   : > { %v7677_v53 = vmul.f32 %v7676_v46, %v7157_v49  ;;  %v7748_v54 = vmul.f32 %v7747_v47, %v7157_v49  ;;  %v7819_v55 = vmul.f32 %v7818_v44, %v7157_v49  ;;  %v7890_v56 = vmul.f32 %v7889_v48, %v7157_v49  ;;  %v9127_v10 = vpop.f32.mrb[15].mxu0 }
 0x2c5   : > { %v7616_v57 = vpop.f32.mrb[14].mxu1 }
 0x2c6   : > { %v7678_v58 = vadd.f32 %v7677_v53, %v7674_v36  ;;  %v7749_v14 = vadd.f32 %v7748_v54, %v7745_v37  ;;  %v7820_v17 = vadd.f32 %v7819_v55, %v7816_v38  ;;  %v7891_v60 = vadd.f32 %v7890_v56, %v7887_v45  ;;  %v9169_v61 = vpop.f32.mrb[15].mxu1 }
 0x2c7   : > { %v7681_v62 = vmul.f32 %v7680_v1, %v7616_v57  ;;  %v7752_v63 = vmul.f32 %v7751_v50, %v7616_v57  ;;  %v7823_v0 = vmul.f32 %v7822_v51, %v7616_v57  ;;  %v7894_v4 = vmul.f32 %v7893_v52, %v7616_v57 }
 0x2c9   : > { %v7682_v6 = vadd.f32 %v7681_v62, %v7678_v58  ;;  %v7753_v7 = vadd.f32 %v7752_v63, %v7749_v14  ;;  %v7824_v8 = vadd.f32 %v7823_v0, %v7820_v17  ;;  %v7895_v9 = vadd.f32 %v7894_v4, %v7891_v60 }
 0x2cb   : > { %v7685_v11 = vadd.f32 %v7684_v2, %v7682_v6  ;;  %v7756_v12 = vadd.f32 %v7755_v3, %v7753_v7  ;;  %v7827_v13 = vadd.f32 %v7826_v5, %v7824_v8  ;;  %v7898_v15 = vadd.f32 %v7897_v59, %v7895_v9 }
 0x2cd   : > { %vm7686_vm9 = vcmp.gt.f32.partialorder %v7685_v11, 0.0  ;;  %v7687_v16 = vmul.f32 0.01, %v7685_v11  ;;  %vm7757_vm10 = vcmp.gt.f32.partialorder %v7756_v12, 0.0  ;;  %v7758_v18 = vmul.f32 0.01, %v7756_v12 }
 0x2ce   : > { %vm7828_vm11 = vcmp.gt.f32.partialorder %v7827_v13, 0.0  ;;  %v7829_v19 = vmul.f32 0.01, %v7827_v13  ;;  %vm7899_vm12 = vcmp.gt.f32.partialorder %v7898_v15, 0.0  ;;  %v7900_v20 = vmul.f32 0.01, %v7898_v15 }
 0x2cf   : > { %v7688_v21 = vsel %vm7686_vm9, %v7685_v11, %v7687_v16  ;;  %v7759_v22 = vsel %vm7757_vm10, %v7756_v12, %v7758_v18 }
 0x2d0   : > { %7690 = vst.msk [vmem:[%s212_s4] sm:$0xff] %vm7689_vm8, %v7688_v21  ;;  %8166 = vst.msk [vmem:[%s212_s4 + $0x8] sm:$0xff] %vm7689_vm8, %v7759_v22  ;;  %v7830_v23 = vsel %vm7828_vm11, %v7827_v13, %v7829_v19  ;;  %v7901_v24 = vsel %vm7899_vm12, %v7898_v15, %v7900_v20 }
 0x2d1   : > { %8184 = vst.msk [vmem:[%s212_s4 + $0x10] sm:$0xff] %vm7689_vm8, %v7830_v23  ;;  %8202 = vst.msk [vmem:[%s212_s4 + $0x18] sm:$0xff] %vm7689_vm8, %v7901_v24 }
 0x2d2   : > { %9744 = shalt.err (!%p9741_p9)
}
 0x2d3   : > { %s9745_s19 = scalar_lea.hbm %s10645_s8, 512  ;;  %s9749_s26 = scalar_lea.hbm %s10704_s3, 1024 }
 0x2d4   : > { %p9746_p12 = scmp.ne.s32.totalorder %s10645_s8, %s9745_s19  ;;  %p9750_p3 = scmp.lt.u32.totalorder %s10645_s8, %s10704_s3 }
 0x2d5   : > { %p9751_p5 = scmp.lt.u32.totalorder %s9749_s26, %s9745_s19  ;;  %p9753_p8 = scmp.lt.u32.totalorder %s9745_s19, %s10645_s8 }
 0x2d6   : > { %p9747_p0 = pnand %p9746_p12, %p10720_p10 }
 0x2d7   : > { %p9752_p4 = por %p9751_p5, %p9750_p3 }
 0x2d8   : > { %p9748_p2 = pneg %p9747_p0 }
 0x2d9   : > { %p9754_p11 = por %p9753_p8, %p9752_p4 }
 0x2db   : > { %p9755_p13 = pnand %p9754_p11, %p9748_p2 }
 0x2dd   : > { %9758 = shalt.err (!%p9755_p13)
}
 0x2de   : > { %s9827_s29 = smov 128   ;;  %s9828_s30 = smov 8  }
 0x2df   : > { %9626 = dma.vmem_to_hbm [thread:$0]  (%p10720_p10), %s10647_s5, 512, %s10645_s8, %s10655_s15, %s9827_s29, %s9827_s29, %s9828_s30  }
 0x2e0 PF: > { %p9643_p1 = scmp.ge.s32.totalorder %s9817_s17, 2  ;;  %s7934_s4 = sand.u32 1, %s9797_s12  }
 0x2e1   : > { %p10721_p6 = scmp.ne.s32.totalorder %s10710_s24, 0  ;;  %s7935_s6 = scalar_lea.sflag [#allocation3], %s7934_s4 }
 0x2e3   : > { %p9636_p7 = pnand %p9643_p1, %p10721_p6 }
 0x2e5   : > { %9792 = dma.done.wait (!%p9636_p7), %s7935_s6, 512  }
 0x2e6   : > { %9794 = vsyncadd (!%p9636_p7), %s7935_s6, 4294966784  ;;  %s18_s17 = sadd.s32 1, %s9817_s17   ;;  %s10722_s12 = smov %s9801_s13 }
 0x2e7   : > { %p15_p9 = scmp.ge.s32.totalorder %s18_s17, 4   ;;  %s10723_s13 = smov %s9805_s14 }
 0x2e8   : > { %s10724_s14 = smov %s9902_s25  ;;  %s10725_s15 = smov %s9813_s16 }
 0x2e9   : > { %s10726_s16 = smov %s10728_s20  ;;  %17 = sbr.rel (!%p15_p9) target bundleno = 6 (0x6), region = 82 }
 0x2f0   :  { %7940 = vsyncpa [#allocation3], 1 }
 0x2f1   :  { %7942 = vsyncpa [#allocation3 + $0x1], 1 }
 0x2f2   :  { %7943 = vsyncpa [#allocation4], 1 }
 0x2f3   :  { %7945 = vsyncpa [#allocation4 + $0x1], 1 }
 0x2f4   :  { %7946 = vsyncpa [#allocation6], 1 }

</bundles_post_ra>
